<compile_context>
chip_gen: v7x
topology: tpu7x:2x2x1
jax: 0.10.0
libtpu: 0.0.40
codegen_flags: <defaults>
</compile_context>

<pallas_src>
import numpy as np
import jax
import jax.numpy as jnp
from jax.experimental import pallas as pl
from jax.experimental.pallas import tpu as pltpu

NO_EDGE_OFFSET_T_CONORM = 0
NO_EDGE_OFFSET_T_NORM = 1


# ---------------------------------------------------------------------------
# Pallas kernel: one FFEdgeCountingLayer forward.
# Grid = (B/bt, Fout/ft, Fin/kt); the Fin axis is the innermost reduction axis.
# ---------------------------------------------------------------------------
def _ff_edge_layer_kernel(x_ref, a_ref, c_ref, s_ref, out_ref, acc_ref):
    k = pl.program_id(2)

    @pl.when(k == 0)
    def _init():
        acc_ref[...] = jnp.full_like(acc_ref, -jnp.inf)

    x = x_ref[...]                              # (bt, kt) f32 activations
    a = a_ref[...].astype(jnp.float32)          # (ft, kt) signed plane {-1,0,1}
    c = c_ref[...].astype(jnp.float32)          # (ft, kt) signed plane {-1,0,1}

    # ev[b,n,f] = s[n]*a0[n,f]*x[b,f] + s[n]*c0[n,f]  (sign pre-folded in wrapper)
    ev = x[:, None, :] * a[None, :, :] + c[None, :, :]          # (bt, ft, kt)
    acc_ref[...] = jnp.maximum(acc_ref[...], jnp.max(ev, axis=-1))

    @pl.when(k == pl.num_programs(2) - 1)
    def _finalize():
        # Undo the sign fold: min == -max(-.) for T_Norm nodes.
        out_ref[...] = s_ref[...] * acc_ref[...]                 # (1,ft)*(bt,ft)


def _pick_tile(dim, candidates):
    for t in candidates:
        if t <= dim and dim % t == 0:
            return t
    return dim  # full extent (always legal as a block dim)


def ff_edge_counting_layer_forward(x, a_signed, c_signed, sign_row):
    """x: (B, Fin) f32; a_signed/c_signed: (Fout, Fin) bf16; sign_row: (1, Fout) f32."""
    B, Fin = x.shape
    Fout = a_signed.shape[0]

    bt = _pick_tile(B, (8,))
    ft = _pick_tile(Fout, (128,))
    kt = _pick_tile(Fin, (512, 128))

    grid = (B // bt, Fout // ft, Fin // kt)

    return pl.pallas_call(
        _ff_edge_layer_kernel,
        out_shape=jax.ShapeDtypeStruct((B, Fout), jnp.float32),
        grid_spec=pltpu.PrefetchScalarGridSpec(
            num_scalar_prefetch=0,
            grid=grid,
            in_specs=[
                pl.BlockSpec((bt, kt), lambda i, j, k: (i, k)),   # x
                pl.BlockSpec((ft, kt), lambda i, j, k: (j, k)),   # a (signed, bf16)
                pl.BlockSpec((ft, kt), lambda i, j, k: (j, k)),   # c (signed, bf16)
                pl.BlockSpec((1, ft), lambda i, j, k: (0, j)),    # sign
            ],
            out_specs=pl.BlockSpec((bt, ft), lambda i, j, k: (i, j)),
            scratch_shapes=[pltpu.VMEM((bt, ft), jnp.float32)],
        ),
        compiler_params=pltpu.CompilerParams(
            dimension_semantics=("parallel", "parallel", "arbitrary"),
            vmem_limit_bytes=48 * 1024 * 1024,
        ),
    )(x, a_signed, c_signed, sign_row)


def ff_autoencoder_forward(x, layer_params):
    h = x
    for p in layer_params:
        h = ff_edge_counting_layer_forward(h, p["a"], p["c"], p["sign"])
    return h


# ---------------------------------------------------------------------------
# Host-side parameter prep (hard Gumbel-softmax selection + plane precompute).
# This replicates FFEdgeCountingLayer.__init__ (all-ones counts) and the
# selection sampling at the top of its forward(); it is data-independent of x.
# ---------------------------------------------------------------------------
def make_layer_params(key, in_features, out_features, n_ops=2, n_edges=2):
    k_e, k_o = jax.random.split(key)
    edge_type_count = jnp.ones((out_features, n_ops, in_features, n_edges), jnp.float32)
    operator_type_count = jnp.ones((out_features, n_ops), jnp.float32)

    # Deterministic hard Gumbel-softmax forward: one-hot at argmax(logits + gumbel).
    g_e = jax.random.gumbel(k_e, edge_type_count.shape, dtype=jnp.float32)
    op_edge_sel = jax.nn.one_hot(jnp.argmax(edge_type_count + g_e, axis=-1),
                                 n_edges, dtype=jnp.float32)      # (Fout,n_ops,Fin,E)
    g_o = jax.random.gumbel(k_o, operator_type_count.shape, dtype=jnp.float32)
    op_sel = jax.nn.one_hot(jnp.argmax(operator_type_count + g_o, axis=-1),
                            n_ops, dtype=jnp.float32)             # (Fout,n_ops)
    op_idx = jnp.argmax(op_sel, axis=-1)                          # (Fout,)
    edge_sel = op_edge_sel[jnp.arange(out_features), op_idx]      # (Fout,Fin,E)

    # operators = [T_Norm.min, T_Conorm.max]  ->  op index 0 is a T_Norm.
    is_tnorm = (op_idx == 0)
    noedge = jnp.where(is_tnorm, float(NO_EDGE_OFFSET_T_NORM),
                       float(NO_EDGE_OFFSET_T_CONORM)).astype(jnp.float32)
    sign = jnp.where(is_tnorm, -1.0, 1.0).astype(jnp.float32)     # fold min into -max(-.)

    sel_ne = edge_sel[:, :, 0]     # no_edge one-hot plane
    sel_nm = edge_sel[:, :, 1]     # normal_edge (identity) one-hot plane

    # Signed affine planes, values in {-1,0,1} (exactly representable in bf16).
    a_signed = (sign[:, None] * sel_nm).astype(jnp.bfloat16)
    c_signed = (sign[:, None] * sel_ne * noedge[:, None]).astype(jnp.bfloat16)
    sign_row = sign.reshape(1, -1)

    return dict(a=a_signed, c=c_signed, sign=sign_row,
                edge_sel=edge_sel, is_tnorm=is_tnorm)


# ---------------------------------------------------------------------------
# Pure-JAX reference of the PyTorch forward (vectorised over the per-node loop).
# ---------------------------------------------------------------------------
def _reference_layer(x, edge_sel, is_tnorm):
    B, Fin = x.shape
    Fout = edge_sel.shape[0]
    noedge = jnp.where(is_tnorm, 1.0, 0.0).astype(jnp.float32)
    etv = jnp.stack([
        jnp.broadcast_to(noedge[:, None, None], (Fout, B, Fin)),  # no_edge value
        jnp.broadcast_to(x[None, :, :], (Fout, B, Fin)),          # normal_edge value
    ], axis=-1)                                                   # (Fout,B,Fin,E)
    ev = jnp.max(edge_sel[:, None, :, :] * etv, axis=-1)          # (Fout,B,Fin)
    out = jnp.where(is_tnorm[:, None],
                    jnp.min(ev, axis=-1), jnp.max(ev, axis=-1))   # (Fout,B)
    return out.T                                                  # (B,Fout)


if __name__ == "__main__":
    # Autoencoder: layer_sizes = [in_features, *hidden_sizes, in_features]
    batch = 16
    in_features = 256
    hidden_sizes = [128]
    layer_sizes = [in_features, *hidden_sizes, in_features]

    key = jax.random.PRNGKey(0)
    keys = jax.random.split(key, len(layer_sizes))
    k_x, k_layers = keys[0], keys[1:]

    # Fuzzy-logic style activations in [0, 1].
    x = jax.random.uniform(k_x, (batch, in_features), dtype=jnp.float32)

    layer_params = [
        make_layer_params(k_layers[i], layer_sizes[i], layer_sizes[i + 1])
        for i in range(len(layer_sizes) - 1)
    ]

    out = ff_autoencoder_forward(x, layer_params)
    out = jax.block_until_ready(out)

    # Reference chain with the same sampled selections.
    ref = x
    for p in layer_params:
        ref = _reference_layer(ref, p["edge_sel"], p["is_tnorm"])

    np.testing.assert_allclose(np.asarray(out), np.asarray(ref), rtol=1e-6, atol=1e-6)

    print("KERNEL_OK")
</pallas_src>

<mosaic_0001>
module attributes {stable_mosaic.version = 11 : i64} {
  func.func @_ff_edge_layer_kernel(%arg0: i32, %arg1: i32, %arg2: i32, %arg3: memref<8x128xf32, #tpu.memory_space<vmem>>, %arg4: memref<128x128xbf16, #tpu.memory_space<vmem>>, %arg5: memref<128x128xbf16, #tpu.memory_space<vmem>>, %arg6: memref<1x128xf32, #tpu.memory_space<vmem>>, %arg7: memref<8x128xf32, #tpu.memory_space<vmem>>, %arg8: memref<8x128xf32, #tpu.memory_space<vmem>>) attributes {dimension_semantics = [#tpu.dimension_semantics<parallel>, #tpu.dimension_semantics<parallel>, #tpu.dimension_semantics<arbitrary>], iteration_bounds = array<i64: 2, 1, 2>, scalar_prefetch = 0 : i64, scratch_operands = 1 : i64, tpu.core_type = #tpu.core_type<tc>, window_params = [{transform_indices = @transform_0, window_bounds = array<i64: 8, 128>}, {transform_indices = @transform_1, window_bounds = array<i64: 128, 128>}, {transform_indices = @transform_2, window_bounds = array<i64: 128, 128>}, {transform_indices = @transform_3, window_bounds = array<i64: 1, 128>}, {transform_indices = @transform_4, window_bounds = array<i64: 8, 128>}]} {
    %c0_i32 = arith.constant 0 : i32
    %0 = arith.cmpi eq, %arg2, %c0_i32 : i32
    %1 = arith.extui %0 : i1 to i32
    %c0_i32_0 = arith.constant 0 : i32
    %2 = arith.cmpi ne, %1, %c0_i32_0 : i32
    scf.if %2 {
      %cst_11 = arith.constant 0xFF800000 : f32
      %23 = vector.broadcast %cst_11 : f32 to vector<8x128xf32>
      %c0_12 = arith.constant 0 : index
      %c0_13 = arith.constant 0 : index
      %24 = vector.load %arg8[%c0_12, %c0_13] : memref<8x128xf32, #tpu.memory_space<vmem>>, vector<8x128xf32>
      tpu.vector_store %arg8[%c0_12, %c0_13], %23 {strides = array<i32>} : memref<8x128xf32, #tpu.memory_space<vmem>>, vector<8x128xf32>,
    } else {
    }
    %c0 = arith.constant 0 : index
    %c0_1 = arith.constant 0 : index
    %3 = vector.load %arg3[%c0, %c0_1] : memref<8x128xf32, #tpu.memory_space<vmem>>, vector<8x128xf32>
    %c0_2 = arith.constant 0 : index
    %c0_3 = arith.constant 0 : index
    %4 = vector.load %arg4[%c0_2, %c0_3] : memref<128x128xbf16, #tpu.memory_space<vmem>>, vector<128x128xbf16>
    %5 = arith.extf %4 : vector<128x128xbf16> to vector<128x128xf32>
    %c0_4 = arith.constant 0 : index
    %c0_5 = arith.constant 0 : index
    %6 = vector.load %arg5[%c0_4, %c0_5] : memref<128x128xbf16, #tpu.memory_space<vmem>>, vector<128x128xbf16>
    %7 = arith.extf %6 : vector<128x128xbf16> to vector<128x128xf32>
    %8 = vector.shape_cast %3 : vector<8x128xf32> to vector<8x1x128xf32>
    %9 = vector.shape_cast %5 : vector<128x128xf32> to vector<1x128x128xf32>
    %10 = vector.broadcast %8 : vector<8x1x128xf32> to vector<8x128x128xf32>
    %11 = vector.broadcast %9 : vector<1x128x128xf32> to vector<8x128x128xf32>
    %12 = arith.mulf %10, %11 : vector<8x128x128xf32>
    %13 = vector.shape_cast %7 : vector<128x128xf32> to vector<1x128x128xf32>
    %14 = vector.broadcast %13 : vector<1x128x128xf32> to vector<8x128x128xf32>
    %15 = arith.addf %12, %14 : vector<8x128x128xf32>
    %c0_6 = arith.constant 0 : index
    %c0_7 = arith.constant 0 : index
    %16 = vector.load %arg8[%c0_6, %c0_7] : memref<8x128xf32, #tpu.memory_space<vmem>>, vector<8x128xf32>
    %cst = arith.constant dense<0xFF800000> : vector<8x128xf32>
    %17 = vector.multi_reduction <maximumf>, %15, %cst [2] : vector<8x128x128xf32> to vector<8x128xf32>
    %18 = arith.maximumf %16, %17 : vector<8x128xf32>
    %c0_8 = arith.constant 0 : index
    %c0_9 = arith.constant 0 : index
    %19 = vector.load %arg8[%c0_8, %c0_9] : memref<8x128xf32, #tpu.memory_space<vmem>>, vector<8x128xf32>
    tpu.vector_store %arg8[%c0_8, %c0_9], %18 {strides = array<i32>} : memref<8x128xf32, #tpu.memory_space<vmem>>, vector<8x128xf32>,
    %c1_i32 = arith.constant 1 : i32
    %20 = arith.cmpi eq, %arg2, %c1_i32 : i32
    %21 = arith.extui %20 : i1 to i32
    %c0_i32_10 = arith.constant 0 : i32
    %22 = arith.cmpi ne, %21, %c0_i32_10 : i32
    scf.if %22 {
      %c0_11 = arith.constant 0 : index
      %c0_12 = arith.constant 0 : index
      %23 = vector.load %arg6[%c0_11, %c0_12] : memref<1x128xf32, #tpu.memory_space<vmem>>, vector<1x128xf32>
      %c0_13 = arith.constant 0 : index
      %c0_14 = arith.constant 0 : index
      %24 = vector.load %arg8[%c0_13, %c0_14] : memref<8x128xf32, #tpu.memory_space<vmem>>, vector<8x128xf32>
      %25 = vector.broadcast %23 : vector<1x128xf32> to vector<8x128xf32>
      %26 = arith.mulf %25, %24 : vector<8x128xf32>
      %c0_15 = arith.constant 0 : index
      %c0_16 = arith.constant 0 : index
      %27 = vector.load %arg7[%c0_15, %c0_16] : memref<8x128xf32, #tpu.memory_space<vmem>>, vector<8x128xf32>
      tpu.vector_store %arg7[%c0_15, %c0_16], %26 {strides = array<i32>} : memref<8x128xf32, #tpu.memory_space<vmem>>, vector<8x128xf32>,
    } else {
    }
    return
  }
  func.func @transform_0(%arg0: i32, %arg1: i32, %arg2: i32) -> (i32, i32) {
    %c0_i32 = arith.constant 0 : i32
    return %arg0, %arg2 : i32, i32
  }
  func.func @transform_1(%arg0: i32, %arg1: i32, %arg2: i32) -> (i32, i32) {
    %c0_i32 = arith.constant 0 : i32
    return %arg1, %arg2 : i32, i32
  }
  func.func @transform_2(%arg0: i32, %arg1: i32, %arg2: i32) -> (i32, i32) {
    %c0_i32 = arith.constant 0 : i32
    return %arg1, %arg2 : i32, i32
  }
  func.func @transform_3(%arg0: i32, %arg1: i32, %arg2: i32) -> (i32, i32) {
    %c0_i32 = arith.constant 0 : i32
    %c0_i32_0 = arith.constant 0 : i32
    return %c0_i32, %arg1 : i32, i32
  }
  func.func @transform_4(%arg0: i32, %arg1: i32, %arg2: i32) -> (i32, i32) {
    %c0_i32 = arith.constant 0 : i32
    return %arg0, %arg1 : i32, i32
  }
}

</mosaic_0001>

<bundles_post_ra>
// kernel: tpu_custom_call.1
= control target key start
LH: loop header
LB: loop body
LE: loop exit
PB: predicated region body
PF: predicated region fallthrough
CT: control target
= control target key end

     0   :  { %s3835_s0 = inlined_call_operand.hbm [shape: f32[16,256], index: 0, kind: input, shape index: {}]   ;;  %s3836_s1 = inlined_call_operand.hbm [shape: bf16[128,256], index: 1, kind: input, shape index: {}]   ;;  %s3837_s2 = inlined_call_operand.hbm [shape: bf16[128,256], index: 2, kind: input, shape index: {}]   ;;  %s3838_s3 = inlined_call_operand.vmem [shape: f32[1,128], index: 3, kind: input, shape index: {}]   ;;  %s3839_s4 = inlined_call_operand.hbm [shape: f32[16,128], index: 4, kind: output, shape index: {}]  }
   0x1   :  { %3868 = sst [smem:[#allocation35_spill]] %s3836_s1 }
   0x2   :  { %3869 = sst [smem:[#allocation36_spill]] %s3837_s2 }
   0x3   :  { %3870 = sst [smem:[#allocation37_spill]] %s3838_s3 }
   0x4   :  { %3871 = sst [smem:[#allocation38_spill]] %s3839_s4 }
   0x5   :  { %9 = vsyncpa [#allocation4], 0 }
   0x6   :  { %11 = vsyncpa [#allocation4 + $0x1], 0 }
   0x7   :  { %12 = vsyncpa [#allocation7], 0 }
   0x8   :  { %14 = vsyncpa [#allocation7 + $0x1], 0 }
   0x9   :  { %15 = vsyncpa [#allocation5], 0 }
   0xa   :  { %17 = vsyncpa [#allocation5 + $0x1], 0  ;;  %s2516_s15 = smov 0   ;;  %s2518_s16 = smov 0  }
   0xb   :  { %s2520_s17 = smov 0   ;;  %s2522_s18 = smov 0  }
   0xc   :  { %s2524_s19 = smov 0   ;;  %s2526_s20 = smov 0  }
   0xd   :  { %s2528_s21 = smov 0   ;;  %s2530_s22 = smov 0  }
   0xe   :  { %s2532_s23 = smov 0   ;;  %s2534_s24 = smov 0  }
   0xf   :  { %s2536_s25 = smov 0   ;;  %s2538_s26 = smov 0  }
  0x10   :  { %s2540_s27 = smov 0   ;;  %s2542_s28 = smov 0  }
  0x11 LB: > { %3872 = sst [smem:[#allocation13_spill]] %s2436_s17  ;;  %p59_p0 = scmp.eq.s32.totalorder %s2480_s28, 0  ;;  %s2480_s28 = sphi %s2542_s28, %s23_s28   ;;  %s2476_s27 = sphi %s2540_s27, %s3952_s27   ;;  %s2472_s26 = sphi %s2538_s26, %s3951_s26   ;;  %s2468_s25 = sphi %s2536_s25, %s3950_s25   ;;  %s2464_s24 = sphi %s2534_s24, %s3949_s24   ;;  %s2460_s23 = sphi %s2532_s23, %s3948_s23   ;;  %s2456_s22 = sphi %s2530_s22, %s3947_s22   ;;  %s2452_s21 = sphi %s2528_s21, %s3946_s21   ;;  %s2448_s20 = sphi %s2526_s20, %s3938_s20   ;;  %s2444_s19 = sphi %s2524_s19, %s3945_s19   ;;  %s2440_s18 = sphi %s2522_s18, %s3944_s18   ;;  %s2436_s17 = sphi %s2520_s17, %s3936_s17   ;;  %s2432_s16 = sphi %s2518_s16, %s3943_s16   ;;  %s2428_s15 = sphi %s2516_s15, %s3942_s15  }
  0x12   : > { %3873 = sst [smem:[#allocation14_spill]] %s2448_s20  ;;  %p86_p1 = scmp.ne.s32.totalorder %s2448_s20, %s2444_s19 }
  0x13   : > { %3874 = sst [smem:[#allocation15_spill]] %s2464_s24  ;;  %p3842_p2 = scmp.lt.s32.totalorder %s2480_s28, 4 }
  0x14   : > { %3875 = sst [smem:[#allocation16_spill]] %s2468_s25  ;;  %s224_s29 = sand.u32 1, %s2480_s28  }
  0x15   : > { %p88_p3 = por %p86_p1, %p59_p0  ;;  %s226_s30 = sand.u32 1, %s2448_s20  }
  0x16   : > { %s3840_s5 = sshll.u32 %s2472_s26, 6  ;;  %s2595_s6 = sshll.u32 %s226_s30, 6 }
  0x17   : > { %s3876_s1 = sld [smem:[#allocation35_spill]]  ;;  %p2606_p4 = pnand %p3842_p2, %p88_p3 }
  0x18   : > { %s228_s11 = scalar_lea.vmem [#allocation6], %s2595_s6  ;;  %s2613_s13 = scalar_lea.sflag [#allocation7], %s224_s29 }
  0x19   : > { %s237_s12 = sshll.u32 %s228_s11, 4  ;;  %p3847_p6 = pneg %p2606_p4  ;;  %s2611_s12 = int_to_ptr.vmem [resolvable:$true] %s237_s12 }
  0x1d   : > { %s2602_s9 = scalar_lea.hbm %s3876_s1, %s3840_s5  ;;  %s2245_s8 = scalar_lea.hbm %s3876_s1, 2048 }
  0x1e   : > { %s2240_s14 = scalar_lea.hbm %s2602_s9, 1024  ;;  %p2246_p9 = scmp.lt.u32.totalorder %s2602_s9, %s3876_s1 }
  0x1f   : > { %p2241_p5 = scmp.ne.s32.totalorder %s2602_s9, %s2240_s14  ;;  %p2247_p10 = scmp.lt.u32.totalorder %s2245_s8, %s2240_s14 }
  0x20   : > { %p2249_p12 = scmp.lt.u32.totalorder %s2240_s14, %s2602_s9 }
  0x21   : > { %p2243_p7 = pnand %p3847_p6, %p2241_p5  ;;  %p2248_p11 = por %p2247_p10, %p2246_p9 }
  0x23   : > { %p2244_p8 = pneg %p2243_p7  ;;  %p2250_p13 = por %p2249_p12, %p2248_p11 }
  0x25   : > { %p2251_p1 = pnand %p2250_p13, %p2244_p8 }
  0x27   : > { %2254 = shalt.err (!%p2251_p1)
}
  0x28   : > { %s2255_s29 = scalar_lea.vmem %s2611_s12, 1024  ;;  %s2482_s11 = smov [#allocation6]  }
  0x29   : > { %p2256_p3 = scmp.ne.s32.totalorder %s2611_s12, %s2255_s29  ;;  %s2260_s30 = sshll.u32 %s2482_s11, 4  ;;  %s2261_s30 = int_to_ptr.vmem [resolvable:$false] %s2260_s30 }
  0x2a   : > { %s2262_s4 = scalar_lea.vmem %s2261_s30, 2048  ;;  %p2263_p2 = scmp.lt.s32.totalorder %s2611_s12, %s2261_s30 }
  0x2b   : > { %p2258_p5 = pnand %p2256_p3, %p3847_p6  ;;  %p2264_p9 = scmp.lt.s32.totalorder %s2262_s4, %s2255_s29 }
  0x2d   : > { %p2259_p7 = pneg %p2258_p5  ;;  %p2265_p10 = por %p2264_p9, %p2263_p2 }
  0x2f   : > { %p2266_p11 = pnand %p2265_p10, %p2259_p7 }
  0x31   : > { %2269 = shalt.err (!%p2266_p11)
}
  0x32   : > { %s3843_s5 = smov 128   ;;  %s3844_s14 = smov 64  }
  0x33   : > { %s3845_s7 = smov 4   ;;  %s251_s29 = scalar_lea.vmem [#allocation8], %s2595_s6 }
  0x34   : > { %2112 = dma.hbm_to_vmem [thread:$0]  (!%p2606_p4), %s2602_s9, 1024, %s2611_s12, %s2613_s13, %s3843_s5, %s3844_s14, %s3845_s7  }
  0x35   : > { %s260_s11 = sshll.u32 %s251_s29, 4  ;;  %p2008_p2 = scmp.ge.s32.totalorder %s2480_s28, 1  ;;  %s2655_s11 = int_to_ptr.vmem [resolvable:$true] %s260_s11 }
  0x36   : > { %s3878_s30 = sshll.u32 %s2472_s26, 6  ;;  %s3879_s2 = sld [smem:[#allocation36_spill]] }
  0x37   : > { %p268_p8 = scmp.lt.s32.totalorder %s2480_s28, 5  ;;  %s2662_s6 = sadd.s32 4294967295, %s2480_s28  }
  0x38   : > { %s35_s12 = sadd.s32 1, %s2472_s26  ;;  %s42_s1 = sadd.s32 1, %s2476_s27 }
  0x39   : > { %p2657_p12 = pnand %p2008_p2, %p268_p8  ;;  %p36_p13 = scmp.ge.s32.totalorder %s35_s12, 2 }
  0x3a   : > { %s1997_s29 = sadd.s32 4294967294, %s2480_s28   ;;  %p58_p1 = scmp.ne.s32.totalorder %s2460_s23, %s2456_s22 }
  0x3b   : > { %s3880_s9 = scalar_select %p2657_p12, 1, 0 }
  0x3c   : > { %s2652_s25 = scalar_lea.hbm %s3879_s2, %s3878_s30  ;;  %s51_s30 = sadd.s32 1, %s2460_s23 }
  0x3d   : > { %s3954_s12 = smov (%p36_p13, %s35_s12), 0  ;;  %s3956_s1 = smov (!%p36_p13, %s42_s1), %s2476_s27 }
  0x3e   : > { %3881 = sst [smem:[#allocation17_spill]] %s3954_s12  ;;  %s47_s4 = ssub.s32 %s2472_s26, %s3954_s12 }
  0x3f   : > { %p44_p3 = scmp.ge.s32.totalorder %s3956_s1, 2  ;;  %p64_p5 = scmp.ne.s32.totalorder %s2456_s22, %s2452_s21 }
  0x40   : > { %p65_p7 = scmp.eq.s32.totalorder %s2662_s6, 0  ;;  %p77_p9 = scmp.eq.s32.totalorder %s47_s4, 0 }
  0x41   : > { %s3958_s1 = smov (%p44_p3, %s3956_s1), 0  ;;  %p92_p11 = scmp.ne.s32.totalorder %s2444_s19, %s2440_s18 }
  0x42   : > { %3882 = sst [smem:[#allocation18_spill]] %s3958_s1  ;;  %p2680_p10 = por %p65_p7, %p64_p5 }
  0x43   : > { %s46_s14 = ssub.s32 %s2476_s27, %s3958_s1  ;;  %s161_s7 = sadd.s32 1, %s2436_s17 }
  0x44   : > { %s3883_s5 = scalar_select %p2680_p10, 1, 0 }
  0x45   : > { %s48_s21 = sor.u32 %s47_s4, %s46_s14  ;;  %p2689_p2 = por %p92_p11, %p65_p7 }
  0x46   : > { %p49_p8 = scmp.eq.s32.totalorder %s48_s21, 0  ;;  %p159_p13 = scmp.eq.s32.totalorder %s46_s14, 0 }
  0x47   : > { %s3884_s8 = scalar_select %p2689_p2, 1, 0 }
  0x48   : > { %s3885_s12 = sadd.s32 1, %s2448_s20  ;;  %p171_p3 = scmp.ne.s32.totalorder %s2436_s17, %s2432_s16 }
  0x49   : > { %s2696_s3 = scalar_select %p77_p9, %s2448_s20, %s3885_s12  }
  0x4a   : > { %s2699_s24 = scalar_select %p49_p8, %s2460_s23, %s51_s30  }
  0x4b   : > { %3886 = sst [smem:[#allocation19_spill]] %s2696_s3  ;;  %p172_p5 = scmp.eq.s32.totalorder %s2662_s6, 3 }
  0x4c   : > { %3887 = sst [smem:[#allocation20_spill]] %s2699_s24  ;;  %p177_p6 = scmp.ne.s32.totalorder %s2432_s16, %s2428_s15 }
  0x4d   : > { %s2702_s18 = scalar_select %p159_p13, %s2436_s17, %s161_s7  }
  0x4e   : > { %p178_p7 = scmp.eq.s32.totalorder %s1997_s29, 3  ;;  %p2709_p11 = por %p172_p5, %p171_p3 }
  0x4f   : > { %3888 = sst [smem:[#allocation21_spill]] %s2702_s18  ;;  %s204_s14 = sand.u32 1, %s2460_s23  }
  0x50   : > { %s3889_s4 = scalar_select %p2709_p11, 1, 0 }
  0x51   : > { %p60_p9 = por %p59_p0, %p58_p1  ;;  %p2719_p8 = por %p178_p7, %p177_p6 }
  0x52   : > { %s2001_s12 = sshll.u32 %s204_s14, 3  ;;  %s2002_s30 = sshll.u32 %s2476_s27, 1 }
  0x53   : > { %s3890_s7 = scalar_select %p2719_p8, 1, 0 }
  0x54   : > { %s213_s21 = sadd.s32 %s2472_s26, %s2002_s30  ;;  %s208_s1 = scalar_lea.vmem [#allocation3], %s2001_s12 }
  0x55   : > { %3891 = sst [smem:[#allocation22_spill]] %s3890_s7  ;;  %s2003_s29 = sshll.u32 %s213_s21, 7 }
  0x56   : > { %s217_s24 = sshll.u32 %s208_s1, 4  ;;  %s2730_s18 = scalar_lea.hbm %s3835_s0, %s2003_s29  ;;  %s2732_s24 = int_to_ptr.vmem [resolvable:$true] %s217_s24 }
  0x57   : > { %p3892_p0 = scmp.lt.s32.totalorder %s2480_s28, 4  ;;  %s2270_s7 = scalar_lea.hbm %s2652_s25, 1024 }
  0x58   : > { %p2271_p1 = scmp.ne.s32.totalorder %s2652_s25, %s2270_s7  ;;  %p3894_p13 = pneg %p2606_p4 }
  0x59   : > { %p2736_p6 = pnand %p3892_p0, %p60_p9  ;;  %s2275_s30 = scalar_lea.hbm %s3879_s2, 2048 }
  0x5a   : > { %p2273_p3 = pnand %p2271_p1, %p3894_p13  ;;  %p2276_p7 = scmp.lt.u32.totalorder %s2652_s25, %s3879_s2 }
  0x5b   : > { %p2277_p8 = scmp.lt.u32.totalorder %s2275_s30, %s2270_s7  ;;  %p2279_p9 = scmp.lt.u32.totalorder %s2270_s7, %s2652_s25 }
  0x5c   : > { %p2274_p5 = pneg %p2273_p3 }
  0x5d   : > { %p2278_p11 = por %p2277_p8, %p2276_p7 }
  0x5f   : > { %p2280_p0 = por %p2279_p9, %p2278_p11 }
  0x61   : > { %p2281_p2 = pnand %p2280_p0, %p2274_p5 }
  0x63   : > { %2284 = shalt.err (!%p2281_p2)
}
  0x64   : > { %s2285_s21 = scalar_lea.vmem %s2655_s11, 1024  ;;  %s2486_s29 = smov [#allocation8]  }
  0x65   : > { %p2286_p1 = scmp.ne.s32.totalorder %s2655_s11, %s2285_s21  ;;  %s2290_s12 = sshll.u32 %s2486_s29, 4  ;;  %s2291_s12 = int_to_ptr.vmem [resolvable:$false] %s2290_s12 }
  0x66   : > { %s2292_s1 = scalar_lea.vmem %s2291_s12, 2048  ;;  %p2293_p12 = scmp.lt.s32.totalorder %s2655_s11, %s2291_s12 }
  0x67   : > { %p2288_p3 = pnand %p2286_p1, %p3894_p13  ;;  %p2294_p8 = scmp.lt.s32.totalorder %s2292_s1, %s2285_s21 }
  0x69   : > { %p2289_p10 = pneg %p2288_p3  ;;  %p2295_p7 = por %p2294_p8, %p2293_p12 }
  0x6b   : > { %p2296_p11 = pnand %p2295_p7, %p2289_p10 }
  0x6d   : > { %2299 = shalt.err (!%p2296_p11)
}
  0x6e   : > { %s3895_s7 = smov 4   ;;  %s3896_s30 = smov 64  }
  0x6f   : > { %s3897_s3 = smov 128   ;;  %s205_s20 = scalar_lea.sflag [#allocation4], %s204_s14 }
  0x70   : > { %2115 = dma.hbm_to_vmem [thread:$0]  (!%p2606_p4), %s2652_s25, 1024, %s2655_s11, %s2613_s13, %s3897_s3, %s3896_s30, %s3895_s7  }
  0x71   : > { %s2300_s21 = scalar_lea.hbm %s2730_s18, 128  ;;  %p2302_p10 = pneg %p2736_p6 }
  0x72   : > { %p2301_p12 = scmp.ne.s32.totalorder %s2730_s18, %s2300_s21  ;;  %s2305_s12 = scalar_lea.hbm %s3835_s0, 512 }
  0x73   : > { %p2306_p9 = scmp.lt.u32.totalorder %s2730_s18, %s3835_s0  ;;  %p2307_p0 = scmp.lt.u32.totalorder %s2305_s12, %s2300_s21 }
  0x74   : > { %p2303_p2 = pnand %p2302_p10, %p2301_p12  ;;  %p2309_p1 = scmp.lt.u32.totalorder %s2300_s21, %s2730_s18 }
  0x75   : > { %p2308_p4 = por %p2307_p0, %p2306_p9 }
  0x76   : > { %p2304_p5 = pneg %p2303_p2 }
  0x77   : > { %p2310_p13 = por %p2309_p1, %p2308_p4 }
  0x79   : > { %p2311_p3 = pnand %p2310_p13, %p2304_p5 }
  0x7b   : > { %2314 = shalt.err (!%p2311_p3)
}
  0x7c   : > { %s2315_s25 = scalar_lea.vmem %s2732_s24, 128  ;;  %s2487_s13 = smov [#allocation3]  }
  0x7d   : > { %p2316_p8 = scmp.ne.s32.totalorder %s2732_s24, %s2315_s25  ;;  %s2320_s11 = sshll.u32 %s2487_s13, 4  ;;  %s2321_s11 = int_to_ptr.vmem [resolvable:$false] %s2320_s11 }
  0x7e   : > { %s2322_s2 = scalar_lea.vmem %s2321_s11, 256  ;;  %p2323_p12 = scmp.lt.s32.totalorder %s2732_s24, %s2321_s11 }
  0x7f   : > { %p2318_p7 = pnand %p2316_p8, %p2302_p10  ;;  %p2324_p2 = scmp.lt.s32.totalorder %s2322_s2, %s2315_s25 }
  0x81   : > { %p2319_p11 = pneg %p2318_p7  ;;  %p2325_p9 = por %p2324_p2, %p2323_p12 }
  0x83   : > { %p2326_p0 = pnand %p2325_p9, %p2319_p11 }
  0x85   : > { %2329 = shalt.err (!%p2326_p0)
}
  0x86   : > { %2109 = dma.hbm_to_vmem [thread:$0]  (!%p2736_p6), %s2730_s18, 128, %s2732_s24, %s205_s20  }
  0x87   : > { %p3898_p5 = scmp.ne.s32.totalorder %s3880_s9, 0 }
  0x89   : > { %272 = sbr.rel (%p3898_p5) target bundleno = 625 (0x271), region = 36 }
  0x90   : > { %s274_s14 = sand.u32 1, %s2456_s22   ;;  %p3899_p10 = scmp.ne.s32.totalorder %s3883_s5, 0 }
  0x91   : > { %s2009_s7 = sshll.u32 %s274_s14, 3  ;;  %s275_s30 = scalar_lea.sflag [#allocation4], %s274_s14 }
  0x92   : > { %s278_s3 = scalar_lea.vmem [#allocation3], %s2009_s7 }
  0x93   : > { %2415 = dma.done.wait (%p3899_p10), %s275_s30, 128  }
  0x94   : > { %2417 = vsyncadd (%p3899_p10), %s275_s30, 4294967168  ;;  %s283_s17 = sand.u32 1, %s2662_s6   ;;  %s285_s21 = sand.u32 1, %s2444_s19  }
  0x95   : > { %s2010_s24 = sshll.u32 %s285_s21, 6  ;;  %s284_s18 = scalar_lea.sflag [#allocation7], %s283_s17 }
  0x96   : > { %s2803_s9 = scalar_lea.vmem [#allocation6], %s2010_s24  ;;  %p3900_p6 = scmp.ne.s32.totalorder %s3884_s8, 0 }
  0x98   : > { %2419 = dma.done.wait (%p3900_p6), %s284_s18, 2048  }
  0x99   : > { %2421 = vsyncadd (%p3900_p6), %s284_s18, 4294965248  ;;  %s331_s20 = sand.u32 1, %s2432_s16   ;;  %s2814_s10 = scalar_lea.vmem [#allocation8], %s2010_s24 }
  0x9a   : > { %s2812_s5 = sshll.u32 %s331_s20, 3  ;;  %s3901_s29 = sld [smem:[#allocation15_spill]] }
  0x9b   : > { %s333_s6 = scalar_lea.vmem [#allocation9], %s2812_s5 }
  0xa0   : > { %p2013_p4 = scmp.ne.s32.totalorder %s3901_s29, 0 }
  0xa1   : > { %v2488_v0 = vmov (!%p2013_p4), -inf  }
  0xa2   : > { %342 = sbr.rel (%p2013_p4) target bundleno = 169 (0xa9), region = 52  ;;  %343 = vst [vmem:[#allocation2] sm:$0xff] (!%p2013_p4), %v2488_v0 }
  0xa9 PF: > { %v3855_v1 = vlaneseq  ;;  %v2489_v2 = vmov 1966171168   ;;  %v344_v6 = vld [vmem:[%s278_s3] sm:$0xff]  ;;  %v2084_v7 = vld [vmem:[%s2803_s9 + $0x8] sm:$0xff]   ;;  %v2021_v9 = vld [vmem:[%s2803_s9] sm:$0xff]   ;;  %vm1151_vm0 = vcmask 130112  }
  0xaa   : > { %v412_v3 = vunpack.c.l.s4 %v2489_v2  ;;  %v410_v12 = vcombine.high %v344_v6, %v344_v6  ;;  %v2832_v13 = vunpack.c.l.bf16 %v2084_v7  ;;  %v2091_v14 = vld [vmem:[%s2814_s10 + $0x8] sm:$0xff]   ;;  %v2053_v15 = vld [vmem:[%s2814_s10] sm:$0xff]   ;;  %v2838_v17 = vunpack.c.l.bf16 %v2021_v9  ;;  %v2085_v20 = vld [vmem:[%s2803_s9 + $0x10] sm:$0xff]   ;;  %s3927_s8 = sld [smem:[#allocation15_spill]] }
  0xab   : > { %v2819_v4 = vshrl.u32 %v3855_v1, 7  ;;  %v2840_v18 = vunpack.c.h.bf16 %v2084_v7  ;;  %v2842_v19 = vunpack.c.h.bf16 %v2021_v9  ;;  %v2845_v21 = vunpack.c.l.bf16 %v2091_v14  ;;  %v2092_v28 = vld [vmem:[%s2814_s10 + $0x10] sm:$0xff]   ;;  %v2086_v34 = vld [vmem:[%s2803_s9 + $0x18] sm:$0xff]   ;;  %v2087_v47 = vld [vmem:[%s2803_s9 + $0x20] sm:$0xff]  }
  0xac   : > { %v413_v5 = vunpack.c.0.s8 %v412_v3  ;;  %v2850_v23 = vunpack.c.l.bf16 %v2053_v15  ;;  %v2855_v25 = vunpack.c.h.bf16 %v2091_v14  ;;  %v2857_v26 = vunpack.c.h.bf16 %v2053_v15  ;;  %v2093_v40 = vld [vmem:[%s2814_s10 + $0x18] sm:$0xff]   ;;  %v2094_v53 = vld [vmem:[%s2814_s10 + $0x20] sm:$0xff]   ;;  %v2088_v57 = vld [vmem:[%s2803_s9 + $0x28] sm:$0xff]  }
  0xad   : > { %3902 = vst [vmem:[#allocation23_spill] sm:$0xff] %v2819_v4  ;;  %v2830_v11 = vsub.s32 0, %v2819_v4  ;;  %v2859_v27 = vunpack.c.h.bf16 %v2085_v20  ;;  %v2862_v29 = vunpack.c.l.bf16 %v2085_v20  ;;  %v2875_v37 = vunpack.c.h.bf16 %v2092_v28  ;;  %v2095_v3 = vld [vmem:[%s2814_s10 + $0x28] sm:$0xff]   ;;  %v2089_v15 = vld [vmem:[%s2803_s9 + $0x30] sm:$0xff]  }
  0xae   : > { %v2823_v8 = vsub.s32 %v413_v5, %v2819_v4  ;;  %v2879_v39 = vunpack.c.h.bf16 %v2086_v34  ;;  %v2882_v41 = vunpack.c.l.bf16 %v2086_v34  ;;  %v2886_v45 = vunpack.c.l.bf16 %v2092_v28 }
  0xaf   : > { %v2891_v48 = vunpack.c.h.bf16 %v2093_v40  ;;  %v2895_v50 = vunpack.c.l.bf16 %v2093_v40  ;;  %v2899_v52 = vunpack.c.h.bf16 %v2087_v47  ;;  %v2904_v56 = vunpack.c.l.bf16 %v2087_v47 }
  0xb0   : > { %v2827_v10 = vrot.slane %v344_v6, %v2823_v8  ;;  %v2853_v24 = vrot.slane %v410_v12, %v2823_v8  ;;  %v2914_v60 = vunpack.c.h.bf16 %v2094_v53  ;;  %v2916_v61 = vunpack.c.l.bf16 %v2094_v53  ;;  %p2014_p1 = scmp.ne.s32.totalorder %s3927_s8, 1 }
  0xb1   : > { %v2923_v2 = vunpack.c.h.bf16 %v2088_v57  ;;  %v2935_v14 = vunpack.c.l.bf16 %v2088_v57  ;;  %v2942_v28 = vunpack.c.l.bf16 %v2095_v3  ;;  %vm1158_vm1 = vcmask 195712   ;;  %s3928_s25 = sld [smem:[#allocation37_spill]] (!%p2014_p1) }
  0xb2   : > { %v433_v16 = vrot.slane %v2827_v10, %v2823_v8  ;;  %v2912_v59 = vrot.slane %v2853_v24, %v2823_v8  ;;  %vm1165_vm2 = vcmask 261312   ;;  %vm1172_vm3 = vcmask 326912  }
  0xb3   : > { %vm1179_vm4 = vcmask 392512   ;;  %vm1186_vm5 = vcmask 458112   ;;  %vm1193_vm6 = vcmask 523712   ;;  %vm1200_vm7 = vcmask 589312  }
  0xb4   : > { %v2848_v22 = vrot.slane %v433_v16, %v2830_v11  ;;  %v455_v42 = vcombine.high %v433_v16, %v433_v16  ;;  %v2938_v16 = vunpack.c.h.bf16 %v2095_v3  ;;  %vm1207_vm8 = vcmask 654912  }
  0xb5   : > { %vm1214_vm9 = vcmask 720512   ;;  %vm1221_vm10 = vcmask 786112   ;;  %vm1228_vm11 = vcmask 851712   ;;  %vm1235_vm12 = vcmask 917312  }
  0xb6   : > { %v501_v30 = vmul.f32 %v2832_v13, %v2848_v22  ;;  %v499_v31 = vmul.f32 %v2838_v17, %v2848_v22  ;;  %v502_v32 = vmul.f32 %v2840_v18, %v2848_v22  ;;  %v500_v33 = vmul.f32 %v2842_v19, %v2848_v22 }
  0xb7   : > { %v504_v38 = vmul.f32 %v2859_v27, %v2848_v22  ;;  %v503_v46 = vmul.f32 %v2862_v29, %v2848_v22  ;;  %v506_v49 = vmul.f32 %v2879_v39, %v2848_v22  ;;  %v505_v51 = vmul.f32 %v2882_v41, %v2848_v22 }
  0xb8   : > { %v629_v35 = vadd.f32 %v2845_v21, %v501_v30  ;;  %v627_v36 = vadd.f32 %v2850_v23, %v499_v31  ;;  %v630_v43 = vadd.f32 %v2855_v25, %v502_v32  ;;  %v628_v44 = vadd.f32 %v2857_v26, %v500_v33  ;;  %v2096_v31 = vld [vmem:[%s2814_s10 + $0x30] sm:$0xff]  }
  0xb9   : > { %v632_v54 = vadd.f32 %v2875_v37, %v504_v38  ;;  %v631_v55 = vadd.f32 %v2886_v45, %v503_v46  ;;  %v2908_v58 = vrot.slane %v455_v42, %v2830_v11  ;;  %v634_v0 = vadd.f32 %v2891_v48, %v506_v49  ;;  %v2090_v38 = vld [vmem:[%s2803_s9 + $0x38] sm:$0xff]  }
  0xba   : > { %760 = vmax.xlane.f32.xlu1 %v629_v35  ;;  %756 = vmax.xlane.f32.xlu0 %v627_v36  ;;  %v633_v7 = vadd.f32 %v2895_v50, %v505_v51  ;;  %v508_v9 = vmul.f32 %v2899_v52, %v2848_v22  ;;  %v507_v12 = vmul.f32 %v2904_v56, %v2848_v22  ;;  %v2944_v30 = vunpack.c.h.bf16 %v2089_v15  ;;  %v2097_v51 = vld [vmem:[%s2814_s10 + $0x38] sm:$0xff]  }
  0xbb   : > { %v531_v62 = vmul.f32 %v2838_v17, %v2908_v58  ;;  %v534_v63 = vmul.f32 %v2840_v18, %v2908_v58  ;;  %v533_v5 = vmul.f32 %v2832_v13, %v2908_v58  ;;  %v535_v6 = vmul.f32 %v2862_v29, %v2908_v58 }
  0xbc   : > { %v510_v20 = vmul.f32 %v2923_v2, %v2848_v22  ;;  %3903 = vst [vmem:[#allocation24_spill] sm:$0xff] %v2944_v30  ;;  %v425_v32 = vcombine.high %v2827_v10, %v2827_v10  ;;  %v636_v33 = vadd.f32 %v2914_v60, %v508_v9  ;;  %v635_v34 = vadd.f32 %v2916_v61, %v507_v12 }
  0xbd   : > { %v509_v35 = vmul.f32 %v2935_v14, %v2848_v22  ;;  %v2953_v36 = vunpack.c.l.bf16 %v2089_v15  ;;  %v2956_v40 = vunpack.c.h.bf16 %v2096_v31  ;;  %v512_v42 = vmul.f32 %v2944_v30, %v2848_v22 }
  0xbe   : > { %762 = vmax.xlane.f32.xlu1 %v630_v43  ;;  %758 = vmax.xlane.f32.xlu0 %v628_v44  ;;  %v2960_v43 = vunpack.c.l.bf16 %v2096_v31  ;;  %v2962_v10 = vunpack.c.h.bf16 %v2090_v38  ;;  %v447_v44 = vrot.slane %v425_v32, %v2823_v8  ;;  %v638_v46 = vadd.f32 %v2938_v16, %v510_v20 }
  0xbf   : > { %v637_v47 = vadd.f32 %v2942_v28, %v509_v35  ;;  %v511_v49 = vmul.f32 %v2953_v36, %v2848_v22  ;;  %v2970_v53 = vunpack.c.l.bf16 %v2090_v38  ;;  %v2979_v57 = vadd.f32 %v2845_v21, %v533_v5 }
  0xc0   : > { %3904 = vst [vmem:[#allocation25_spill] sm:$0xff] %v2962_v10  ;;  %v2984_v3 = vunpack.c.h.bf16 %v2097_v51  ;;  %v2989_v9 = vrot.slane %v447_v44, %v2830_v11  ;;  %v2993_v12 = vunpack.c.l.bf16 %v2097_v51  ;;  %v3004_v32 = vrot.slane %v2912_v59, %v2830_v11 }
  0xc1   : > { %v513_v5 = vmul.f32 %v2970_v53, %v2848_v22  ;;  %vm1242_vm13 = vcmask 982912   ;;  %vm1249_vm14 = vcmask 1048512   ;;  %vm1804_vm15 = vcmask 1041409  }
  0xc2   : > { %766 = vmax.xlane.f32.xlu1 %v632_v54  ;;  %764 = vmax.xlane.f32.xlu0 %v631_v55  ;;  %v2973_v54 = vadd.f32 %v2850_v23, %v531_v62  ;;  %v2976_v55 = vadd.f32 %v2855_v25, %v534_v63  ;;  %v640_v62 = vadd.f32 %v2956_v40, %v512_v42 }
  0xc3   : > { %v639_v63 = vadd.f32 %v2960_v43, %v511_v49  ;;  %v516_v20 = vmul.f32 %v2842_v19, %v2989_v9  ;;  %v515_v31 = vmul.f32 %v2838_v17, %v2989_v9  ;;  %3905 = vst [vmem:[#allocation26_spill] sm:$0xff] %v3004_v32  ;;  %v564_v35 = vmul.f32 %v2842_v19, %v3004_v32 }
  0xc4   : > { %v563_v38 = vmul.f32 %v2838_v17, %v3004_v32  ;;  %v566_v42 = vmul.f32 %v2840_v18, %v3004_v32 }
  0xc6   : > { %770 = vmax.xlane.f32.xlu1 %v634_v0  ;;  %768 = vmax.xlane.f32.xlu0 %v633_v7  ;;  %v2982_v0 = vadd.f32 %v2886_v45, %v535_v6  ;;  %v514_v7 = vmul.f32 %v2962_v10, %v2848_v22  ;;  %v457_v6 = vcombine.high %v447_v44, %v447_v44 }
  0xc7   : > { %v518_v22 = vmul.f32 %v2840_v18, %v2989_v9  ;;  %v565_v44 = vmul.f32 %v2832_v13, %v3004_v32 }
  0xc8   : > { %v642_v15 = vadd.f32 %v2984_v3, %v514_v7  ;;  %v644_v7 = vadd.f32 %v2857_v26, %v516_v20 }
  0xca   : > { %774 = vmax.xlane.f32.xlu1 %v636_v33  ;;  %772 = vmax.xlane.f32.xlu0 %v635_v34  ;;  %v641_v33 = vadd.f32 %v2993_v12, %v513_v5  ;;  %v3010_v34 = vrot.slane %v457_v6, %v2830_v11 }
  0xcc   : > { %3906 = vst [vmem:[#allocation27_spill] sm:$0xff] %v3010_v34  ;;  %v550_v49 = vmul.f32 %v2840_v18, %v3010_v34  ;;  %v549_v51 = vmul.f32 %v2832_v13, %v3010_v34  ;;  %v551_v5 = vmul.f32 %v2862_v29, %v3010_v34 }
  0xce   : > { %778 = vmax.xlane.f32.xlu1 %v638_v46  ;;  %776 = vmax.xlane.f32.xlu0 %v637_v47  ;;  %v548_v46 = vmul.f32 %v2842_v19, %v3010_v34  ;;  %v547_v47 = vmul.f32 %v2838_v17, %v3010_v34  ;;  %v3041_v4 = vadd.f32 %v2855_v25, %v550_v49 }
  0xcf   : > { %v3044_v20 = vadd.f32 %v2845_v21, %v549_v51  ;;  %v520_v34 = vmul.f32 %v2859_v27, %v2989_v9  ;;  %v3059_v49 = vadd.f32 %v2850_v23, %v563_v38  ;;  %v3062_v51 = vadd.f32 %v2855_v25, %v566_v42 }
  0xd0   : > { %v3035_v6 = vadd.f32 %v2857_v26, %v548_v46  ;;  %v3038_v1 = vadd.f32 %v2850_v23, %v547_v47  ;;  %v519_v46 = vmul.f32 %v2862_v29, %v2989_v9  ;;  %v3056_v47 = vadd.f32 %v2857_v26, %v564_v35 }
  0xd1   : > { %3907 = vst [vmem:[#allocation28_spill] sm:$0xff] %v3059_v49  ;;  %3908 = vst [vmem:[#allocation29_spill] sm:$0xff] %v3062_v51  ;;  %v648_v35 = vadd.f32 %v2875_v37, %v520_v34  ;;  %v521_v38 = vmul.f32 %v2882_v41, %v2989_v9  ;;  %v523_v34 = vmul.f32 %v2904_v56, %v2989_v9 }
  0xd2   : > { %782 = vmax.xlane.f32.xlu1 %v640_v62  ;;  %780 = vmax.xlane.f32.xlu0 %v639_v63  ;;  %v643_v62 = vadd.f32 %v2850_v23, %v515_v31  ;;  %v517_v63 = vmul.f32 %v2832_v13, %v2989_v9  ;;  %v3047_v31 = vadd.f32 %v2886_v45, %v551_v5 }
  0xd6   : > { %786 = vmax.xlane.f32.xlu1 %v642_v15  ;;  %784 = vmax.xlane.f32.xlu0 %v641_v33  ;;  %v646_v15 = vadd.f32 %v2855_v25, %v518_v22  ;;  %v645_v33 = vadd.f32 %v2845_v21, %v517_v63  ;;  %v567_v22 = vmul.f32 %v2862_v29, %v3004_v32 }
  0xd7   : > { %v647_v63 = vadd.f32 %v2886_v45, %v519_v46 }
  0xd8   : > { %v3076_v42 = vadd.f32 %v2886_v45, %v567_v22  ;;  %v651_v22 = vadd.f32 %v2916_v61, %v523_v34 }
  0xda   : > { %790 = vmax.xlane.f32.xlu1 %v644_v7  ;;  %788 = vmax.xlane.f32.xlu0 %v643_v62  ;;  %v522_v7 = vmul.f32 %v2879_v39, %v2989_v9  ;;  %v3067_v62 = vadd.f32 %v2845_v21, %v565_v44  ;;  %3910 = vst [vmem:[#allocation31_spill] sm:$0xff] %v3076_v42 }
  0xdb   : > { %v649_v44 = vadd.f32 %v2895_v50, %v521_v38  ;;  %v456_v42 = vcombine.high %v2912_v59, %v2912_v59  ;;  %v530_v59 = vmul.f32 %v2962_v10, %v2989_v9 }
  0xdc   : > { %3909 = vst [vmem:[#allocation30_spill] sm:$0xff] %v3067_v62  ;;  %v650_v5 = vadd.f32 %v2891_v48, %v522_v7  ;;  %v525_v7 = vmul.f32 %v2935_v14, %v2989_v9 }
  0xde   : > { %794 = vmax.xlane.f32.xlu1 %v646_v15  ;;  %792 = vmax.xlane.f32.xlu0 %v645_v33  ;;  %v524_v15 = vmul.f32 %v2899_v52, %v2989_v9  ;;  %v526_v33 = vmul.f32 %v2923_v2, %v2989_v9 }
  0xe0   : > { %v652_v46 = vadd.f32 %v2914_v60, %v524_v15  ;;  %v527_v15 = vmul.f32 %v2953_v36, %v2989_v9 }
  0xe2   : > { %798 = vmax.xlane.f32.xlu1 %v648_v35  ;;  %796 = vmax.xlane.f32.xlu0 %v647_v63  ;;  %v426_v35 = vcombine.high %v2853_v24, %v2853_v24  ;;  %v528_v63 = vmul.f32 %v2944_v30, %v2989_v9  ;;  %v3105_v24 = vrot.slane %v456_v42, %v2830_v11 }
  0xe4   : > { %v454_v38 = vrot.slane %v426_v35, %v2823_v8  ;;  %3911 = vst [vmem:[#allocation32_spill] sm:$0xff] %v3105_v24  ;;  %v656_v8 = vadd.f32 %v2956_v40, %v528_v63  ;;  %v655_v35 = vadd.f32 %v2960_v43, %v527_v15 }
  0xe6   : > { %802 = vmax.xlane.f32.xlu1 %v650_v5  ;;  %800 = vmax.xlane.f32.xlu0 %v649_v44  ;;  %v654_v5 = vadd.f32 %v2938_v16, %v526_v33  ;;  %v653_v44 = vadd.f32 %v2942_v28, %v525_v7  ;;  %v3102_v34 = vrot.slane %v454_v38, %v2830_v11 }
  0xe7   : > { %v595_v7 = vmul.f32 %v2838_v17, %v3105_v24 }
  0xe8   : > { %v580_v33 = vmul.f32 %v2842_v19, %v3102_v34  ;;  %v581_v42 = vmul.f32 %v2832_v13, %v3102_v34  ;;  %v582_v63 = vmul.f32 %v2840_v18, %v3102_v34 }
  0xe9   : > { %v3132_v32 = vadd.f32 %v2850_v23, %v595_v7  ;;  %v583_v7 = vmul.f32 %v2862_v29, %v3102_v34 }
  0xea   : > { %806 = vmax.xlane.f32.xlu1 %v652_v46  ;;  %804 = vmax.xlane.f32.xlu0 %v651_v22  ;;  %v529_v46 = vmul.f32 %v2970_v53, %v2989_v9  ;;  %v579_v22 = vmul.f32 %v2838_v17, %v3102_v34  ;;  %v596_v9 = vmul.f32 %v2842_v19, %v3105_v24 }
  0xeb   : > { %v3126_v62 = vadd.f32 %v2857_v26, %v580_v33  ;;  %v3140_v15 = vadd.f32 %v2855_v25, %v582_v63  ;;  %v658_v33 = vadd.f32 %v2984_v3, %v530_v59  ;;  %v598_v63 = vmul.f32 %v2840_v18, %v3105_v24 }
  0xec   : > { %v3129_v51 = vadd.f32 %v2850_v23, %v579_v22  ;;  %v3143_v49 = vadd.f32 %v2857_v26, %v596_v9  ;;  %v597_v22 = vmul.f32 %v2832_v13, %v3105_v24  ;;  %v599_v9 = vmul.f32 %v2862_v29, %v3105_v24 }
  0xee   : > { %810 = vmax.xlane.f32.xlu1 %v654_v5  ;;  %808 = vmax.xlane.f32.xlu0 %v653_v44  ;;  %3912 = vst [vmem:[#allocation33_spill] sm:$0xff] %v3129_v51  ;;  %v3135_v5 = vadd.f32 %v2845_v21, %v581_v42  ;;  %v532_v44 = vmul.f32 %v2842_v19, %v2908_v58  ;;  %3913 = vst [vmem:[#allocation34_spill] sm:$0xff] %v3143_v49 }
  0xef   : > { %v458_v51 = vcombine.high %v454_v38, %v454_v38  ;;  %v657_v42 = vadd.f32 %v2993_v12, %v529_v46  ;;  %v3156_v49 = vadd.f32 %v2845_v21, %v597_v22  ;;  %v3162_v38 = vadd.f32 %v2886_v45, %v583_v7 }
  0xf0   : > { %v3168_v46 = vadd.f32 %v2886_v45, %v599_v9 }
  0xf1   : > { %v3159_v59 = vrot.slane %v458_v51, %v2830_v11  ;;  %v660_v51 = vadd.f32 %v2857_v26, %v532_v44 }
  0xf2   : > { %814 = vmax.xlane.f32.xlu1 %v656_v8  ;;  %812 = vmax.xlane.f32.xlu0 %v655_v35  ;;  %v3165_v8 = vadd.f32 %v2855_v25, %v598_v63 }
  0xf3   : > { %v611_v35 = vmul.f32 %v2838_v17, %v3159_v59  ;;  %v612_v24 = vmul.f32 %v2842_v19, %v3159_v59  ;;  %v613_v22 = vmul.f32 %v2832_v13, %v3159_v59  ;;  %v614_v11 = vmul.f32 %v2840_v18, %v3159_v59 }
  0xf4   : > { %v615_v7 = vmul.f32 %v2862_v29, %v3159_v59  ;;  %v536_v29 = vmul.f32 %v2859_v27, %v2908_v58 }
  0xf5   : > { %v3182_v63 = vadd.f32 %v2850_v23, %v611_v35  ;;  %v3185_v17 = vadd.f32 %v2857_v26, %v612_v24  ;;  %v3188_v19 = vadd.f32 %v2845_v21, %v613_v22  ;;  %v3191_v13 = vadd.f32 %v2855_v25, %v614_v11 }
  0xf6   : > { %818 = vmax.xlane.f32.xlu1 %v658_v33  ;;  %816 = vmax.xlane.f32.xlu0 %v657_v42  ;;  %v3194_v18 = vadd.f32 %v2886_v45, %v615_v7  ;;  %v538_v23 = vmul.f32 %v2879_v39, %v2908_v58  ;;  %v664_v21 = vadd.f32 %v2875_v37, %v536_v29 }
  0xf7   : > { %v537_v25 = vmul.f32 %v2882_v41, %v2908_v58  ;;  %v544_v33 = vmul.f32 %v2944_v30, %v2908_v58  ;;  %v543_v35 = vmul.f32 %v2953_v36, %v2908_v58  ;;  %v545_v7 = vmul.f32 %v2970_v53, %v2908_v58 }
  0xf8   : > { %v666_v26 = vadd.f32 %v2891_v48, %v538_v23 }
  0xf9   : > { %v665_v45 = vadd.f32 %v2895_v50, %v537_v25  ;;  %v672_v22 = vadd.f32 %v2956_v40, %v544_v33  ;;  %v671_v11 = vadd.f32 %v2960_v43, %v543_v35  ;;  %v673_v23 = vadd.f32 %v2993_v12, %v545_v7  ;;  %v3915_v7 = vld [vmem:[#allocation28_spill] sm:$0xff] }
  0xfa   : > { %822 = vmax.xlane.f32.xlu1 %v660_v51  ;;  %820 = vmax.xlane.f32.xlu0 %v2973_v54  ;;  %v540_v54 = vmul.f32 %v2899_v52, %v2908_v58  ;;  %v546_v51 = vmul.f32 %v2962_v10, %v2908_v58 }
  0xfc   : > { %v668_v24 = vadd.f32 %v2914_v60, %v540_v54  ;;  %v674_v29 = vadd.f32 %v2984_v3, %v546_v51 }
  0xfe   : > { %826 = vmax.xlane.f32.xlu1 %v2976_v55  ;;  %824 = vmax.xlane.f32.xlu0 %v2979_v57  ;;  %v539_v55 = vmul.f32 %v2904_v56, %v2908_v58  ;;  %v542_v57 = vmul.f32 %v2923_v2, %v2908_v58 }
 0x100   : > { %v667_v44 = vadd.f32 %v2916_v61, %v539_v55  ;;  %v670_v42 = vadd.f32 %v2938_v16, %v542_v57 }
 0x102   : > { %830 = vmax.xlane.f32.xlu1 %v664_v21  ;;  %828 = vmax.xlane.f32.xlu0 %v2982_v0  ;;  %v541_v0 = vmul.f32 %v2935_v14, %v2908_v58  ;;  %v3914_v21 = vld [vmem:[#allocation27_spill] sm:$0xff] }
 0x103   : > { %v552_v25 = vmul.f32 %v2859_v27, %v3914_v21  ;;  %v559_v33 = vmul.f32 %v2953_v36, %v3914_v21 }
 0x104   : > { %v669_v9 = vadd.f32 %v2942_v28, %v541_v0 }
 0x105   : > { %v680_v58 = vadd.f32 %v2875_v37, %v552_v25  ;;  %v687_v35 = vadd.f32 %v2960_v43, %v559_v33  ;;  %v3917_v25 = vlaneseq }
 0x106   : > { %834 = vmax.xlane.f32.xlu1 %v666_v26  ;;  %832 = vmax.xlane.f32.xlu0 %v665_v45  ;;  %v554_v26 = vmul.f32 %v2879_v39, %v3914_v21  ;;  %v553_v45 = vmul.f32 %v2882_v41, %v3914_v21 }
 0x108   : > { %v682_v54 = vadd.f32 %v2891_v48, %v554_v26  ;;  %v3276_v26 = vand.u32 127, %v3917_v25 }
 0x10a   : > { %838 = vmax.xlane.f32.xlu1 %v668_v24  ;;  %836 = vmax.xlane.f32.xlu0 %v667_v44  ;;  %v560_v24 = vmul.f32 %v2944_v30, %v3914_v21  ;;  %v1146_v33 = vadd.s32 4294967288, %v3276_v26 }
 0x10e   : > { %842 = vmax.xlane.f32.xlu1 %v670_v42  ;;  %840 = vmax.xlane.f32.xlu0 %v669_v9  ;;  %v562_v42 = vmul.f32 %v2962_v10, %v3914_v21  ;;  %v688_v9 = vadd.f32 %v2956_v40, %v560_v24  ;;  %v3921_v24 = vld [vmem:[#allocation23_spill] sm:$0xff] }
 0x112   : > { %846 = vmax.xlane.f32.xlu1 %v672_v22  ;;  %844 = vmax.xlane.f32.xlu0 %v671_v11  ;;  %v561_v22 = vmul.f32 %v2970_v53, %v3914_v21  ;;  %v690_v11 = vadd.f32 %v2984_v3, %v562_v42 }
 0x114   : > { %v689_v51 = vadd.f32 %v2993_v12, %v561_v22 }
 0x116   : > { %850 = vmax.xlane.f32.xlu1 %v674_v29  ;;  %848 = vmax.xlane.f32.xlu0 %v673_v23  ;;  %v3916_v29 = vld [vmem:[#allocation26_spill] sm:$0xff] }
 0x117   : > { %v568_v23 = vmul.f32 %v2859_v27, %v3916_v29  ;;  %v573_v22 = vmul.f32 %v2935_v14, %v3916_v29 }
 0x11a   : > { %854 = vmax.xlane.f32.xlu1 %v3035_v6  ;;  %852 = vmax.xlane.f32.xlu0 %v3038_v1  ;;  %v681_v1 = vadd.f32 %v2895_v50, %v553_v45  ;;  %v556_v6 = vmul.f32 %v2899_v52, %v3914_v21  ;;  %v696_v45 = vadd.f32 %v2875_v37, %v568_v23  ;;  %v1174_v23 = vadd.s32 4294967256, %v3276_v26 }
 0x11c   : > { %v684_v55 = vadd.f32 %v2914_v60, %v556_v6  ;;  %v572_v6 = vmul.f32 %v2899_v52, %v3916_v29 }
 0x11e   : > { %858 = vmax.xlane.f32.xlu1 %v3041_v4  ;;  %856 = vmax.xlane.f32.xlu0 %v3044_v20  ;;  %v555_v4 = vmul.f32 %v2904_v56, %v3914_v21  ;;  %v558_v20 = vmul.f32 %v2923_v2, %v3914_v21  ;;  %v700_v42 = vadd.f32 %v2914_v60, %v572_v6 }
 0x11f   : > { %v701_v6 = vadd.f32 %v2942_v28, %v573_v22 }
 0x120   : > { %v683_v57 = vadd.f32 %v2916_v61, %v555_v4  ;;  %v686_v44 = vadd.f32 %v2938_v16, %v558_v20  ;;  %v3920_v4 = vld [vmem:[#allocation31_spill] sm:$0xff] }
 0x122   : > { %862 = vmax.xlane.f32.xlu1 %v680_v58  ;;  %860 = vmax.xlane.f32.xlu0 %v3047_v31  ;;  %v557_v31 = vmul.f32 %v2935_v14, %v3914_v21  ;;  %v3918_v58 = vld [vmem:[#allocation29_spill] sm:$0xff]  ;;  %v3919_v21 = vld [vmem:[#allocation30_spill] sm:$0xff] }
 0x124   : > { %v685_v0 = vadd.f32 %v2942_v28, %v557_v31  ;;  %v1160_v31 = vadd.s32 4294967272, %v3276_v26 }
 0x126   : > { %866 = vmax.xlane.f32.xlu1 %v682_v54  ;;  %864 = vmax.xlane.f32.xlu0 %v681_v1  ;;  %v570_v54 = vmul.f32 %v2879_v39, %v3916_v29  ;;  %v1153_v1 = vadd.s32 4294967280, %v3276_v26 }
 0x128   : > { %v698_v20 = vadd.f32 %v2891_v48, %v570_v54  ;;  %v576_v54 = vmul.f32 %v2944_v30, %v3916_v29 }
 0x12a   : > { %870 = vmax.xlane.f32.xlu1 %v684_v55  ;;  %868 = vmax.xlane.f32.xlu0 %v683_v57  ;;  %v571_v57 = vmul.f32 %v2904_v56, %v3916_v29 }
 0x12e   : > { %874 = vmax.xlane.f32.xlu1 %v686_v44  ;;  %872 = vmax.xlane.f32.xlu0 %v685_v0  ;;  %v3295_v44 = vsub.s32 %v1153_v1, %v3921_v24  ;;  %v3299_v0 = vsub.s32 %v3276_v26, %v3921_v24 }
 0x132   : > { %878 = vmax.xlane.f32.xlu1 %v688_v9  ;;  %876 = vmax.xlane.f32.xlu0 %v687_v35  ;;  %v699_v9 = vadd.f32 %v2916_v61, %v571_v57  ;;  %v574_v35 = vmul.f32 %v2923_v2, %v3916_v29  ;;  %v1188_v57 = vadd.s32 4294967240, %v3276_v26 }
 0x134   : > { %v702_v1 = vadd.f32 %v2938_v16, %v574_v35  ;;  %v704_v35 = vadd.f32 %v2956_v40, %v576_v54  ;;  %v3343_v30 = vsub.s32 %v1188_v57, %v3921_v24  ;;  %v1202_v54 = vadd.s32 4294967224, %v3276_v26 }
 0x136   : > { %882 = vmax.xlane.f32.xlu1 %v690_v11  ;;  %880 = vmax.xlane.f32.xlu0 %v689_v51 }
 0x13a   : > { %886 = vmax.xlane.f32.xlu1 %v3056_v47  ;;  %884 = vmax.xlane.f32.xlu0 %v3915_v7  ;;  %v569_v47 = vmul.f32 %v2882_v41, %v3916_v29  ;;  %v3309_v7 = vsub.s32 %v1160_v31, %v3921_v24 }
 0x13c   : > { %v697_v55 = vadd.f32 %v2895_v50, %v569_v47  ;;  %v575_v47 = vmul.f32 %v2953_v36, %v3916_v29 }
 0x13e   : > { %890 = vmax.xlane.f32.xlu1 %v3918_v58  ;;  %888 = vmax.xlane.f32.xlu0 %v3919_v21  ;;  %v3315_v21 = vsub.s32 %v1146_v33, %v3921_v24  ;;  %v703_v22 = vadd.f32 %v2960_v43, %v575_v47 }
 0x142   : > { %894 = vmax.xlane.f32.xlu1 %v696_v45  ;;  %892 = vmax.xlane.f32.xlu0 %v3920_v4  ;;  %v1167_v45 = vadd.s32 4294967264, %v3276_v26 }
 0x146   : > { %898 = vmax.xlane.f32.xlu1 %v698_v20  ;;  %896 = vmax.xlane.f32.xlu0 %v697_v55  ;;  %v3325_v55 = vsub.s32 %v1174_v23, %v3921_v24  ;;  %v577_v23 = vmul.f32 %v2970_v53, %v3916_v29 }
 0x147   : > { %v761_v11 = vpop.xlane.xlu1 %760  ;;  %v757_v51 = vpop.xlane.xlu0 %756 }
 0x148   : > { %v1157_v25 = vrot.slane %v761_v11, %v3295_v44  ;;  %v1145_v58 = vrot.slane %v757_v51, %v3299_v0  ;;  %v578_v51 = vmul.f32 %v2962_v10, %v3916_v29  ;;  %v705_v57 = vadd.f32 %v2993_v12, %v577_v23 }
 0x14a   : > { %902 = vmax.xlane.f32.xlu1 %v700_v42  ;;  %900 = vmax.xlane.f32.xlu0 %v699_v9  ;;  %v3331_v42 = vsub.s32 %v1167_v45, %v3921_v24  ;;  %v1181_v9 = vadd.s32 4294967248, %v3276_v26 }
 0x14b   : > { %v763_v4 = vpop.xlane.xlu1 %762  ;;  %v759_v20 = vpop.xlane.xlu0 %758 }
 0x14c   : > { %v1164_v31 = vrot.slane %v763_v4, %v3309_v7  ;;  %v1150_v33 = vrot.slane %v759_v20, %v3315_v21 }
 0x14e   : > { %v1152_v11 = vsel %vm1151_vm0, %v1150_v33, %v1145_v58  ;;  %906 = vmax.xlane.f32.xlu1 %v702_v1  ;;  %904 = vmax.xlane.f32.xlu0 %v701_v6  ;;  %v1195_v58 = vadd.s32 4294967232, %v3276_v26  ;;  %v3351_v33 = vsub.s32 %v1181_v9, %v3921_v24 }
 0x14f   : > { %v1159_v45 = vsel %vm1158_vm1, %v1157_v25, %v1152_v11  ;;  %v767_v4 = vpop.xlane.xlu1 %766  ;;  %v765_v20 = vpop.xlane.xlu0 %764  ;;  %v706_v25 = vadd.f32 %v2984_v3, %v578_v51  ;;  %v1209_v51 = vadd.s32 4294967216, %v3276_v26 }
 0x150   : > { %v1178_v47 = vrot.slane %v767_v4, %v3325_v55  ;;  %v1166_v1 = vsel %vm1165_vm2, %v1164_v31, %v1159_v45  ;;  %v1171_v6 = vrot.slane %v765_v20, %v3331_v42  ;;  %v3358_v31 = vsub.s32 %v1202_v54, %v3921_v24 }
 0x151   : > { %v3361_v9 = vsub.s32 %v1195_v58, %v3921_v24  ;;  %v1230_v58 = vadd.s32 4294967192, %v3276_v26 }
 0x152   : > { %v1173_v29 = vsel %vm1172_vm3, %v1171_v6, %v1166_v1  ;;  %910 = vmax.xlane.f32.xlu1 %v704_v35  ;;  %908 = vmax.xlane.f32.xlu0 %v703_v22  ;;  %v1216_v22 = vadd.s32 4294967208, %v3276_v26  ;;  %v1223_v1 = vadd.s32 4294967200, %v3276_v26 }
 0x153   : > { %v771_v11 = vpop.xlane.xlu1 %770  ;;  %v1180_v10 = vsel %vm1179_vm4, %v1178_v47, %v1173_v29  ;;  %v769_v4 = vpop.xlane.xlu0 %768 }
 0x154   : > { %v1192_v45 = vrot.slane %v771_v11, %v3343_v30  ;;  %v1185_v35 = vrot.slane %v769_v4, %v3351_v33  ;;  %v3374_v11 = vsub.s32 %v1216_v22, %v3921_v24  ;;  %v3387_v22 = vsub.s32 %v1223_v1, %v3921_v24 }
 0x156   : > { %v1187_v23 = vsel %vm1186_vm5, %v1185_v35, %v1180_v10  ;;  %914 = vmax.xlane.f32.xlu1 %v706_v25  ;;  %912 = vmax.xlane.f32.xlu0 %v705_v57  ;;  %v3377_v10 = vsub.s32 %v1209_v51, %v3921_v24  ;;  %v3922_v57 = vld [vmem:[#allocation33_spill] sm:$0xff] }
 0x157   : > { %v775_v20 = vpop.xlane.xlu1 %774  ;;  %v1194_v54 = vsel %vm1193_vm6, %v1192_v45, %v1187_v23  ;;  %v773_v47 = vpop.xlane.xlu0 %772  ;;  %v3384_v23 = vsub.s32 %v1230_v58, %v3921_v24 }
 0x158   : > { %v1206_v6 = vrot.slane %v775_v20, %v3358_v31  ;;  %v1199_v29 = vrot.slane %v773_v47, %v3361_v9 }
 0x15a   : > { %v1201_v25 = vsel %vm1200_vm7, %v1199_v29, %v1194_v54  ;;  %918 = vmax.xlane.f32.xlu1 %v3126_v62  ;;  %916 = vmax.xlane.f32.xlu0 %v3922_v57  ;;  %v1244_v62 = vadd.s32 4294967176, %v3276_v26  ;;  %v1237_v54 = vadd.s32 4294967184, %v3276_v26 }
 0x15b   : > { %v779_v4 = vpop.xlane.xlu1 %778  ;;  %v1208_v45 = vsel %vm1207_vm8, %v1206_v6, %v1201_v25  ;;  %v777_v35 = vpop.xlane.xlu0 %776 }
 0x15c   : > { %v1220_v51 = vrot.slane %v779_v4, %v3374_v11  ;;  %v1213_v20 = vrot.slane %v777_v35, %v3377_v10  ;;  %v3400_v57 = vsub.s32 %v1244_v62, %v3921_v24  ;;  %v3403_v26 = vsub.s32 %v1237_v54, %v3921_v24 }
 0x15e   : > { %v1215_v47 = vsel %vm1214_vm9, %v1213_v20, %v1208_v45  ;;  %948 = vmax.xlane.f32.xlu1 %v3132_v32  ;;  %920 = vmax.xlane.f32.xlu0 %v3135_v5  ;;  %v3923_v5 = vld [vmem:[#allocation34_spill] sm:$0xff] }
 0x15f   : > { %v783_v58 = vpop.xlane.xlu1 %782  ;;  %v1222_v6 = vsel %vm1221_vm10, %v1220_v51, %v1215_v47  ;;  %v781_v1 = vpop.xlane.xlu0 %780 }
 0x160   : > { %v1234_v29 = vrot.slane %v783_v58, %v3384_v23  ;;  %v1227_v25 = vrot.slane %v781_v1, %v3387_v22 }
 0x162   : > { %v1229_v32 = vsel %vm1228_vm11, %v1227_v25, %v1222_v6  ;;  %922 = vmax.xlane.f32.xlu1 %v3140_v15  ;;  %950 = vmax.xlane.f32.xlu0 %v3923_v5 }
 0x163   : > { %v787_v4 = vpop.xlane.xlu1 %786  ;;  %v1236_v45 = vsel %vm1235_vm12, %v1234_v29, %v1229_v32  ;;  %v785_v35 = vpop.xlane.xlu0 %784 }
 0x164   : > { %v1248_v51 = vrot.slane %v787_v4, %v3400_v57  ;;  %v1241_v20 = vrot.slane %v785_v35, %v3403_v26 }
 0x166   : > { %v1243_v62 = vsel %vm1242_vm13, %v1241_v20, %v1236_v45  ;;  %952 = vmax.xlane.f32.xlu0 %v3156_v49  ;;  %980 = vmax.xlane.f32.xlu1 %v3182_v63  ;;  %v584_v49 = vmul.f32 %v2859_v27, %v3102_v34  ;;  %v3924_v20 = vld [vmem:[#allocation32_spill] sm:$0xff] }
 0x167   : > { %v3415_v15 = vsel %vm1249_vm14, %v1248_v51, %v1243_v62  ;;  %v791_v24 = vpop.xlane.xlu1 %790  ;;  %v789_v54 = vpop.xlane.xlu0 %788  ;;  %v600_v62 = vmul.f32 %v2859_v27, %v3924_v20 }
 0x168   : > { %v1258_v47 = vrot.slane %v791_v24, %v3315_v21  ;;  %v1254_v58 = vrot.slane %v789_v54, %v3299_v0  ;;  %v712_v5 = vadd.f32 %v2875_v37, %v584_v49 }
 0x169   : > { %v728_v49 = vadd.f32 %v2875_v37, %v600_v62 }
 0x16a   : > { %v1259_v6 = vsel %vm1151_vm0, %v1258_v47, %v1254_v58  ;;  %982 = vmax.xlane.f32.xlu0 %v3185_v17  ;;  %924 = vmax.xlane.f32.xlu1 %v3162_v38  ;;  %v585_v38 = vmul.f32 %v2882_v41, %v3102_v34 }
 0x16b   : > { %v795_v1 = vpop.xlane.xlu1 %794  ;;  %v793_v63 = vpop.xlane.xlu0 %792 }
 0x16c   : > { %v1268_v29 = vrot.slane %v795_v1, %v3309_v7  ;;  %v1263_v25 = vrot.slane %v793_v63, %v3295_v44  ;;  %v601_v63 = vmul.f32 %v2882_v41, %v3924_v20 }
 0x16e   : > { %v1264_v32 = vsel %vm1158_vm1, %v1263_v25, %v1259_v6  ;;  %954 = vmax.xlane.f32.xlu0 %v3165_v8  ;;  %984 = vmax.xlane.f32.xlu1 %v3188_v19  ;;  %v713_v19 = vadd.f32 %v2895_v50, %v585_v38 }
 0x16f   : > { %v799_v17 = vpop.xlane.xlu1 %798  ;;  %v1269_v4 = vsel %vm1165_vm2, %v1268_v29, %v1264_v32  ;;  %v797_v45 = vpop.xlane.xlu0 %796 }
 0x170   : > { %v1278_v35 = vrot.slane %v799_v17, %v3325_v55  ;;  %v1273_v51 = vrot.slane %v797_v45, %v3331_v42  ;;  %v616_v17 = vmul.f32 %v2859_v27, %v3159_v59 }
 0x172   : > { %v1274_v8 = vsel %vm1172_vm3, %v1273_v51, %v1269_v4  ;;  %926 = vmax.xlane.f32.xlu0 %v712_v5  ;;  %956 = vmax.xlane.f32.xlu1 %v3168_v46  ;;  %v586_v46 = vmul.f32 %v2879_v39, %v3102_v34 }
 0x173   : > { %v803_v24 = vpop.xlane.xlu1 %802  ;;  %v1279_v54 = vsel %vm1179_vm4, %v1278_v35, %v1274_v8  ;;  %v801_v47 = vpop.xlane.xlu0 %800  ;;  %v729_v35 = vadd.f32 %v2895_v50, %v601_v63  ;;  %v588_v63 = vmul.f32 %v2899_v52, %v3102_v34 }
 0x174   : > { %v1288_v58 = vrot.slane %v803_v24, %v3343_v30  ;;  %v1283_v6 = vrot.slane %v801_v47, %v3351_v33  ;;  %v714_v45 = vadd.f32 %v2891_v48, %v586_v46  ;;  %v744_v24 = vadd.f32 %v2875_v37, %v616_v17 }
 0x176   : > { %v1284_v1 = vsel %vm1186_vm5, %v1283_v6, %v1279_v54  ;;  %986 = vmax.xlane.f32.xlu0 %v3191_v13  ;;  %928 = vmax.xlane.f32.xlu1 %v713_v19  ;;  %v587_v13 = vmul.f32 %v2904_v56, %v3102_v34 }
 0x177   : > { %v807_v29 = vpop.xlane.xlu1 %806  ;;  %v1289_v25 = vsel %vm1193_vm6, %v1288_v58, %v1284_v1  ;;  %v805_v32 = vpop.xlane.xlu0 %804  ;;  %v617_v58 = vmul.f32 %v2882_v41, %v3159_v59 }
 0x178   : > { %v1298_v5 = vrot.slane %v807_v29, %v3358_v31  ;;  %v1293_v38 = vrot.slane %v805_v32, %v3361_v9  ;;  %v715_v54 = vadd.f32 %v2916_v61, %v587_v13  ;;  %v603_v29 = vmul.f32 %v2904_v56, %v3924_v20 }
 0x179   : > { %v745_v32 = vadd.f32 %v2895_v50, %v617_v58  ;;  %v618_v50 = vmul.f32 %v2879_v39, %v3159_v59 }
 0x17a   : > { %v1294_v4 = vsel %vm1200_vm7, %v1293_v38, %v1289_v25  ;;  %958 = vmax.xlane.f32.xlu0 %v728_v49  ;;  %988 = vmax.xlane.f32.xlu1 %v3194_v18  ;;  %v602_v18 = vmul.f32 %v2879_v39, %v3924_v20  ;;  %v619_v39 = vmul.f32 %v2904_v56, %v3159_v59 }
 0x17b   : > { %v811_v51 = vpop.xlane.xlu1 %810  ;;  %v1299_v62 = vsel %vm1207_vm8, %v1298_v5, %v1294_v4  ;;  %v809_v8 = vpop.xlane.xlu0 %808 }
 0x17c   : > { %v1308_v19 = vrot.slane %v811_v51, %v3374_v11  ;;  %v1303_v27 = vrot.slane %v809_v8, %v3377_v10  ;;  %v730_v41 = vadd.f32 %v2891_v48, %v602_v18  ;;  %v604_v18 = vmul.f32 %v2899_v52, %v3924_v20 }
 0x17e   : > { %v1304_v47 = vsel %vm1214_vm9, %v1303_v27, %v1299_v62  ;;  %930 = vmax.xlane.f32.xlu0 %v714_v45  ;;  %960 = vmax.xlane.f32.xlu1 %v729_v35  ;;  %v716_v45 = vadd.f32 %v2914_v60, %v588_v63  ;;  %v731_v35 = vadd.f32 %v2916_v61, %v603_v29 }
 0x17f   : > { %v815_v6 = vpop.xlane.xlu1 %814  ;;  %v1309_v49 = vsel %vm1221_vm10, %v1308_v19, %v1304_v47  ;;  %v813_v1 = vpop.xlane.xlu0 %812  ;;  %v589_v62 = vmul.f32 %v2935_v14, %v3102_v34  ;;  %v732_v63 = vadd.f32 %v2914_v60, %v604_v18  ;;  %v747_v29 = vadd.f32 %v2916_v61, %v619_v39 }
 0x180   : > { %v1318_v46 = vrot.slane %v815_v6, %v3384_v23  ;;  %v1313_v37 = vrot.slane %v813_v1, %v3387_v22  ;;  %v746_v6 = vadd.f32 %v2891_v48, %v618_v50  ;;  %v605_v48 = vmul.f32 %v2935_v14, %v3924_v20 }
 0x181   : > { %v620_v61 = vmul.f32 %v2899_v52, %v3159_v59  ;;  %v621_v18 = vmul.f32 %v2935_v14, %v3159_v59 }
 0x182   : > { %v1314_v25 = vsel %vm1228_vm11, %v1313_v37, %v1309_v49  ;;  %990 = vmax.xlane.f32.xlu0 %v744_v24  ;;  %932 = vmax.xlane.f32.xlu1 %v715_v54  ;;  %v717_v49 = vadd.f32 %v2942_v28, %v589_v62 }
 0x183   : > { %v819_v5 = vpop.xlane.xlu1 %818  ;;  %v1319_v38 = vsel %vm1235_vm12, %v1318_v46, %v1314_v25  ;;  %v817_v17 = vpop.xlane.xlu0 %816  ;;  %v590_v25 = vmul.f32 %v2923_v2, %v3102_v34  ;;  %v748_v52 = vadd.f32 %v2914_v60, %v620_v61 }
 0x184   : > { %v1328_v13 = vrot.slane %v819_v5, %v3400_v57  ;;  %v1323_v4 = vrot.slane %v817_v17, %v3403_v26 }
 0x186   : > { %v1324_v51 = vsel %vm1242_vm13, %v1323_v4, %v1319_v38  ;;  %962 = vmax.xlane.f32.xlu0 %v730_v41  ;;  %992 = vmax.xlane.f32.xlu1 %v745_v32 }
 0x187   : > { %v1329_v8 = vsel %vm1249_vm14, %v1328_v13, %v1324_v51  ;;  %v823_v19 = vpop.xlane.xlu1 %822  ;;  %v821_v27 = vpop.xlane.xlu0 %820  ;;  %v591_v13 = vmul.f32 %v2953_v36, %v3102_v34 }
 0x188   : > { %v3493_v24 = vsel %vm1804_vm15, %v1329_v8, %v3415_v15  ;;  %v1337_v54 = vrot.slane %v823_v19, %v3315_v21  ;;  %v1333_v47 = vrot.slane %v821_v27, %v3299_v0  ;;  %vm1806_vm15 = vcmask 1042434  }
 0x189   : > { %v719_v27 = vadd.f32 %v2960_v43, %v591_v13 }
 0x18a   : > { %v1338_v58 = vsel %vm1151_vm0, %v1337_v54, %v1333_v47  ;;  %934 = vmax.xlane.f32.xlu0 %v716_v45  ;;  %964 = vmax.xlane.f32.xlu1 %v731_v35  ;;  %v718_v45 = vadd.f32 %v2938_v16, %v590_v25  ;;  %v733_v35 = vadd.f32 %v2942_v28, %v605_v48 }
 0x18b   : > { %v827_v15 = vpop.xlane.xlu1 %826  ;;  %v825_v1 = vpop.xlane.xlu0 %824  ;;  %v606_v47 = vmul.f32 %v2923_v2, %v3924_v20 }
 0x18c   : > { %v1347_v46 = vrot.slane %v827_v15, %v3309_v7  ;;  %v1342_v37 = vrot.slane %v825_v1, %v3295_v44  ;;  %v3925_v15 = vld [vmem:[#allocation24_spill] sm:$0xff] }
 0x18d   : > { %v592_v1 = vmul.f32 %v3925_v15, %v3102_v34  ;;  %v734_v14 = vadd.f32 %v2938_v16, %v606_v47 }
 0x18e   : > { %v1343_v56 = vsel %vm1158_vm1, %v1342_v37, %v1338_v58  ;;  %994 = vmax.xlane.f32.xlu0 %v746_v6  ;;  %936 = vmax.xlane.f32.xlu1 %v717_v49 }
 0x18f   : > { %v831_v41 = vpop.xlane.xlu1 %830  ;;  %v1348_v32 = vsel %vm1165_vm2, %v1347_v46, %v1343_v56  ;;  %v829_v5 = vpop.xlane.xlu0 %828  ;;  %v607_v46 = vmul.f32 %v2953_v36, %v3924_v20 }
 0x190   : > { %v1357_v38 = vrot.slane %v831_v41, %v3325_v55  ;;  %v1352_v17 = vrot.slane %v829_v5, %v3331_v42 }
 0x191   : > { %v735_v5 = vadd.f32 %v2960_v43, %v607_v46 }
 0x192   : > { %v1353_v4 = vsel %vm1172_vm3, %v1352_v17, %v1348_v32  ;;  %966 = vmax.xlane.f32.xlu0 %v732_v63  ;;  %996 = vmax.xlane.f32.xlu1 %v747_v29  ;;  %v749_v63 = vadd.f32 %v2942_v28, %v621_v18  ;;  %v720_v32 = vadd.f32 %v2956_v40, %v592_v1 }
 0x193   : > { %v835_v51 = vpop.xlane.xlu1 %834  ;;  %v1358_v50 = vsel %vm1179_vm4, %v1357_v38, %v1353_v4  ;;  %v833_v62 = vpop.xlane.xlu0 %832  ;;  %v622_v17 = vmul.f32 %v2923_v2, %v3159_v59  ;;  %v593_v28 = vmul.f32 %v2970_v53, %v3102_v34 }
 0x194   : > { %v1367_v8 = vrot.slane %v835_v51, %v3343_v30  ;;  %v1362_v19 = vrot.slane %v833_v62, %v3351_v33  ;;  %v608_v51 = vmul.f32 %v3925_v15, %v3924_v20 }
 0x195   : > { %v750_v2 = vadd.f32 %v2938_v16, %v622_v17  ;;  %v3926_v16 = vld [vmem:[#allocation25_spill] sm:$0xff] }
 0x196   : > { %v1363_v54 = vsel %vm1186_vm5, %v1362_v19, %v1358_v50  ;;  %938 = vmax.xlane.f32.xlu0 %v718_v45  ;;  %968 = vmax.xlane.f32.xlu1 %v733_v35  ;;  %v623_v50 = vmul.f32 %v2953_v36, %v3159_v59  ;;  %v736_v18 = vadd.f32 %v2956_v40, %v608_v51 }
 0x197   : > { %v839_v39 = vpop.xlane.xlu1 %838  ;;  %v1368_v58 = vsel %vm1193_vm6, %v1367_v8, %v1363_v54  ;;  %v837_v6 = vpop.xlane.xlu0 %836  ;;  %v721_v8 = vadd.f32 %v2993_v12, %v593_v28 }
 0x198   : > { %v1377_v49 = vrot.slane %v839_v39, %v3358_v31  ;;  %v1372_v60 = vrot.slane %v837_v6, %v3361_v9  ;;  %v751_v36 = vadd.f32 %v2960_v43, %v623_v50  ;;  %v609_v6 = vmul.f32 %v2970_v53, %v3924_v20 }
 0x19a   : > { %v1373_v37 = vsel %vm1200_vm7, %v1372_v60, %v1368_v58  ;;  %998 = vmax.xlane.f32.xlu0 %v748_v52  ;;  %940 = vmax.xlane.f32.xlu1 %v719_v27  ;;  %v594_v58 = vmul.f32 %v3926_v16, %v3102_v34  ;;  %v610_v34 = vmul.f32 %v3926_v16, %v3924_v20 }
 0x19b   : > { %v843_v29 = vpop.xlane.xlu1 %842  ;;  %v1378_v56 = vsel %vm1207_vm8, %v1377_v49, %v1373_v37  ;;  %v841_v25 = vpop.xlane.xlu0 %840 }
 0x19c   : > { %v1387_v48 = vrot.slane %v843_v29, %v3374_v11  ;;  %v1382_v41 = vrot.slane %v841_v25, %v3377_v10  ;;  %v722_v29 = vadd.f32 %v2984_v3, %v594_v58 }
 0x19e   : > { %v1383_v38 = vsel %vm1214_vm9, %v1382_v41, %v1378_v56  ;;  %970 = vmax.xlane.f32.xlu0 %v734_v14  ;;  %1000 = vmax.xlane.f32.xlu1 %v749_v63  ;;  %v624_v14 = vmul.f32 %v3925_v15, %v3159_v59  ;;  %v737_v56 = vadd.f32 %v2993_v12, %v609_v6 }
 0x19f   : > { %v847_v61 = vpop.xlane.xlu1 %846  ;;  %v1388_v13 = vsel %vm1221_vm10, %v1387_v48, %v1383_v38  ;;  %v845_v4 = vpop.xlane.xlu0 %844  ;;  %v738_v15 = vadd.f32 %v2984_v3, %v610_v34  ;;  %v626_v38 = vmul.f32 %v3926_v16, %v3159_v59 }
 0x1a0   : > { %v1397_v45 = vrot.slane %v847_v61, %v3384_v23  ;;  %v1392_v35 = vrot.slane %v845_v4, %v3387_v22 }
 0x1a2   : > { %v1393_v62 = vsel %vm1228_vm11, %v1392_v35, %v1388_v13  ;;  %942 = vmax.xlane.f32.xlu0 %v720_v32  ;;  %972 = vmax.xlane.f32.xlu1 %v735_v5  ;;  %v752_v32 = vadd.f32 %v2956_v40, %v624_v14  ;;  %v625_v5 = vmul.f32 %v2970_v53, %v3159_v59 }
 0x1a3   : > { %v851_v19 = vpop.xlane.xlu1 %850  ;;  %v1398_v52 = vsel %vm1235_vm12, %v1397_v45, %v1393_v62  ;;  %v849_v27 = vpop.xlane.xlu0 %848  ;;  %v754_v35 = vadd.f32 %v2984_v3, %v626_v38 }
 0x1a4   : > { %v1407_v54 = vrot.slane %v851_v19, %v3400_v57  ;;  %v1402_v47 = vrot.slane %v849_v27, %v3403_v26  ;;  %v753_v45 = vadd.f32 %v2993_v12, %v625_v5 }
 0x1a6   : > { %v1403_v39 = vsel %vm1242_vm13, %v1402_v47, %v1398_v52  ;;  %1002 = vmax.xlane.f32.xlu0 %v750_v2  ;;  %944 = vmax.xlane.f32.xlu1 %v721_v8 }
 0x1a7   : > { %v1408_v49 = vsel %vm1249_vm14, %v1407_v54, %v1403_v39  ;;  %v855_v60 = vpop.xlane.xlu1 %854  ;;  %v853_v1 = vpop.xlane.xlu0 %852 }
 0x1a8   : > { %v3575_v46 = vsel %vm1806_vm15, %v1408_v49, %v3493_v24  ;;  %v1416_v37 = vrot.slane %v855_v60, %v3315_v21  ;;  %v1412_v43 = vrot.slane %v853_v1, %v3299_v0  ;;  %vm1808_vm15 = vcmask 1043459  }
 0x1aa   : > { %v1417_v63 = vsel %vm1151_vm0, %v1416_v37, %v1412_v43  ;;  %974 = vmax.xlane.f32.xlu0 %v736_v18  ;;  %1004 = vmax.xlane.f32.xlu1 %v751_v36 }
 0x1ab   : > { %v859_v24 = vpop.xlane.xlu1 %858  ;;  %v857_v25 = vpop.xlane.xlu0 %856 }
 0x1ac   : > { %v1426_v48 = vrot.slane %v859_v24, %v3309_v7  ;;  %v1421_v41 = vrot.slane %v857_v25, %v3295_v44 }
 0x1ae   : > { %v1422_v20 = vsel %vm1158_vm1, %v1421_v41, %v1417_v63  ;;  %946 = vmax.xlane.f32.xlu0 %v722_v29  ;;  %976 = vmax.xlane.f32.xlu1 %v737_v56 }
 0x1af   : > { %v863_v17 = vpop.xlane.xlu1 %862  ;;  %v1427_v28 = vsel %vm1165_vm2, %v1426_v48, %v1422_v20  ;;  %v861_v61 = vpop.xlane.xlu0 %860 }
 0x1b0   : > { %v1436_v13 = vrot.slane %v863_v17, %v3325_v55  ;;  %v1431_v40 = vrot.slane %v861_v61, %v3331_v42 }
 0x1b2   : > { %v1432_v4 = vsel %vm1172_vm3, %v1431_v40, %v1427_v28  ;;  %1006 = vmax.xlane.f32.xlu0 %v752_v32  ;;  %978 = vmax.xlane.f32.xlu1 %v738_v15 }
 0x1b3   : > { %v867_v53 = vpop.xlane.xlu1 %866  ;;  %v1437_v51 = vsel %vm1179_vm4, %v1436_v13, %v1432_v4  ;;  %v865_v59 = vpop.xlane.xlu0 %864 }
 0x1b4   : > { %v1446_v50 = vrot.slane %v867_v53, %v3343_v30  ;;  %v1441_v62 = vrot.slane %v865_v59, %v3351_v33 }
 0x1b6   : > { %v1442_v2 = vsel %vm1186_vm5, %v1441_v62, %v1437_v51  ;;  %1008 = vmax.xlane.f32.xlu0 %v753_v45  ;;  %1010 = vmax.xlane.f32.xlu1 %v754_v35 }
 0x1b7   : > { %v871_v8 = vpop.xlane.xlu1 %870  ;;  %v1447_v19 = vsel %vm1193_vm6, %v1446_v50, %v1442_v2  ;;  %v869_v52 = vpop.xlane.xlu0 %868 }
 0x1b8   : > { %v1456_v12 = vrot.slane %v871_v8, %v3358_v31  ;;  %v1451_v3 = vrot.slane %v869_v52, %v3361_v9 }
 0x1ba   : > { %v1452_v27 = vsel %vm1200_vm7, %v1451_v3, %v1447_v19 }
 0x1bb   : > { %v875_v54 = vpop.xlane.xlu1 %874  ;;  %v1457_v47 = vsel %vm1207_vm8, %v1456_v12, %v1452_v27  ;;  %v873_v18 = vpop.xlane.xlu0 %872 }
 0x1bc   : > { %v1466_v36 = vrot.slane %v875_v54, %v3374_v11  ;;  %v1461_v39 = vrot.slane %v873_v18, %v3377_v10 }
 0x1be   : > { %v1462_v16 = vsel %vm1214_vm9, %v1461_v39, %v1457_v47 }
 0x1bf   : > { %v879_v58 = vpop.xlane.xlu1 %878  ;;  %v1467_v6 = vsel %vm1221_vm10, %v1466_v36, %v1462_v16  ;;  %v877_v49 = vpop.xlane.xlu0 %876 }
 0x1c0   : > { %v1476_v60 = vrot.slane %v879_v58, %v3384_v23  ;;  %v1471_v1 = vrot.slane %v877_v49, %v3387_v22 }
 0x1c2   : > { %v1472_v37 = vsel %vm1228_vm11, %v1471_v1, %v1467_v6 }
 0x1c3   : > { %v883_v43 = vpop.xlane.xlu1 %882  ;;  %v1477_v14 = vsel %vm1235_vm12, %v1476_v60, %v1472_v37  ;;  %v881_v34 = vpop.xlane.xlu0 %880 }
 0x1c4   : > { %v1486_v63 = vrot.slane %v883_v43, %v3400_v57  ;;  %v1481_v29 = vrot.slane %v881_v34, %v3403_v26 }
 0x1c6   : > { %v1482_v56 = vsel %vm1242_vm13, %v1481_v29, %v1477_v14 }
 0x1c7   : > { %v1487_v24 = vsel %vm1249_vm14, %v1486_v63, %v1482_v56  ;;  %v887_v25 = vpop.xlane.xlu1 %886  ;;  %v885_v48 = vpop.xlane.xlu0 %884 }
 0x1c8   : > { %v1809_v41 = vsel %vm1808_vm15, %v1487_v24, %v3575_v46  ;;  %v1495_v32 = vrot.slane %v887_v25, %v3315_v21  ;;  %v1491_v15 = vrot.slane %v885_v48, %v3299_v0  ;;  %vm1810_vm15 = vcmask 1044484  }
 0x1ca   : > { %v1496_v20 = vsel %vm1151_vm0, %v1495_v32, %v1491_v15 }
 0x1cb   : > { %v891_v5 = vpop.xlane.xlu1 %890  ;;  %v889_v38 = vpop.xlane.xlu0 %888 }
 0x1cc   : > { %v1505_v17 = vrot.slane %v891_v5, %v3309_v7  ;;  %v1500_v28 = vrot.slane %v889_v38, %v3295_v44 }
 0x1ce   : > { %v1501_v61 = vsel %vm1158_vm1, %v1500_v28, %v1496_v20 }
 0x1cf   : > { %v895_v13 = vpop.xlane.xlu1 %894  ;;  %v1506_v40 = vsel %vm1165_vm2, %v1505_v17, %v1501_v61  ;;  %v893_v4 = vpop.xlane.xlu0 %892 }
 0x1d0   : > { %v1515_v46 = vrot.slane %v895_v13, %v3325_v55  ;;  %v1510_v45 = vrot.slane %v893_v4, %v3331_v42 }
 0x1d2   : > { %v1511_v35 = vsel %vm1172_vm3, %v1510_v45, %v1506_v40 }
 0x1d3   : > { %v899_v53 = vpop.xlane.xlu1 %898  ;;  %v1516_v51 = vsel %vm1179_vm4, %v1515_v46, %v1511_v35  ;;  %v897_v59 = vpop.xlane.xlu0 %896 }
 0x1d4   : > { %v1525_v50 = vrot.slane %v899_v53, %v3343_v30  ;;  %v1520_v62 = vrot.slane %v897_v59, %v3351_v33 }
 0x1d6   : > { %v1521_v2 = vsel %vm1186_vm5, %v1520_v62, %v1516_v51 }
 0x1d7   : > { %v903_v8 = vpop.xlane.xlu1 %902  ;;  %v1526_v19 = vsel %vm1193_vm6, %v1525_v50, %v1521_v2  ;;  %v901_v52 = vpop.xlane.xlu0 %900 }
 0x1d8   : > { %v1535_v12 = vrot.slane %v903_v8, %v3358_v31  ;;  %v1530_v3 = vrot.slane %v901_v52, %v3361_v9 }
 0x1da   : > { %v1531_v27 = vsel %vm1200_vm7, %v1530_v3, %v1526_v19 }
 0x1db   : > { %v907_v54 = vpop.xlane.xlu1 %906  ;;  %v1536_v47 = vsel %vm1207_vm8, %v1535_v12, %v1531_v27  ;;  %v905_v18 = vpop.xlane.xlu0 %904 }
 0x1dc   : > { %v1545_v36 = vrot.slane %v907_v54, %v3374_v11  ;;  %v1540_v39 = vrot.slane %v905_v18, %v3377_v10 }
 0x1de   : > { %v1541_v16 = vsel %vm1214_vm9, %v1540_v39, %v1536_v47 }
 0x1df   : > { %v911_v58 = vpop.xlane.xlu1 %910  ;;  %v1546_v6 = vsel %vm1221_vm10, %v1545_v36, %v1541_v16  ;;  %v909_v49 = vpop.xlane.xlu0 %908 }
 0x1e0   : > { %v1555_v60 = vrot.slane %v911_v58, %v3384_v23  ;;  %v1550_v1 = vrot.slane %v909_v49, %v3387_v22 }
 0x1e2   : > { %v1551_v37 = vsel %vm1228_vm11, %v1550_v1, %v1546_v6 }
 0x1e3   : > { %v915_v43 = vpop.xlane.xlu1 %914  ;;  %v1556_v14 = vsel %vm1235_vm12, %v1555_v60, %v1551_v37  ;;  %v913_v34 = vpop.xlane.xlu0 %912 }
 0x1e4   : > { %v1565_v63 = vrot.slane %v915_v43, %v3400_v57  ;;  %v1560_v29 = vrot.slane %v913_v34, %v3403_v26 }
 0x1e6   : > { %v1561_v56 = vsel %vm1242_vm13, %v1560_v29, %v1556_v14 }
 0x1e7   : > { %v1566_v24 = vsel %vm1249_vm14, %v1565_v63, %v1561_v56  ;;  %v919_v25 = vpop.xlane.xlu1 %918  ;;  %v917_v48 = vpop.xlane.xlu0 %916 }
 0x1e8   : > { %v1574_v32 = vrot.slane %v919_v25, %v3315_v21  ;;  %v1570_v15 = vrot.slane %v917_v48, %v3299_v0  ;;  %v3656_v20 = vsel %vm1810_vm15, %v1566_v24, %v1809_v41 }
 0x1ea   : > { %v1575_v5 = vsel %vm1151_vm0, %v1574_v32, %v1570_v15 }
 0x1eb   : > { %v949_v38 = vpop.xlane.xlu1 %948  ;;  %v921_v17 = vpop.xlane.xlu0 %920 }
 0x1ec   : > { %v1649_v28 = vrot.slane %v949_v38, %v3299_v0  ;;  %v1579_v61 = vrot.slane %v921_v17, %v3295_v44 }
 0x1ee   : > { %v1580_v13 = vsel %vm1158_vm1, %v1579_v61, %v1575_v5 }
 0x1ef   : > { %v923_v40 = vpop.xlane.xlu1 %922  ;;  %v951_v4 = vpop.xlane.xlu0 %950 }
 0x1f0   : > { %v1584_v46 = vrot.slane %v923_v40, %v3309_v7  ;;  %v1653_v45 = vrot.slane %v951_v4, %v3315_v21 }
 0x1f2   : > { %v1585_v35 = vsel %vm1165_vm2, %v1584_v46, %v1580_v13  ;;  %v1654_v41 = vsel %vm1151_vm0, %v1653_v45, %v1649_v28 }
 0x1f3   : > { %v953_v53 = vpop.xlane.xlu0 %952  ;;  %v981_v51 = vpop.xlane.xlu1 %980 }
 0x1f4   : > { %v1658_v59 = vrot.slane %v953_v53, %v3295_v44  ;;  %v1728_v50 = vrot.slane %v981_v51, %v3299_v0 }
 0x1f6   : > { %v1659_v62 = vsel %vm1158_vm1, %v1658_v59, %v1654_v41 }
 0x1f7   : > { %v983_v2 = vpop.xlane.xlu0 %982  ;;  %v925_v8 = vpop.xlane.xlu1 %924 }
 0x1f8   : > { %v1732_v19 = vrot.slane %v983_v2, %v3315_v21  ;;  %v1589_v52 = vrot.slane %v925_v8, %v3331_v42 }
 0x1fa   : > { %v1733_v12 = vsel %vm1151_vm0, %v1732_v19, %v1728_v50  ;;  %v1590_v3 = vsel %vm1172_vm3, %v1589_v52, %v1585_v35  ;;  %vm1812_vm0 = vcmask 1045509  }
 0x1fb   : > { %v955_v27 = vpop.xlane.xlu0 %954  ;;  %v985_v54 = vpop.xlane.xlu1 %984 }
 0x1fc   : > { %v1663_v47 = vrot.slane %v955_v27, %v3309_v7  ;;  %v1737_v18 = vrot.slane %v985_v54, %v3295_v44 }
 0x1fe   : > { %v1664_v0 = vsel %vm1165_vm2, %v1663_v47, %v1659_v62  ;;  %v1738_v36 = vsel %vm1158_vm1, %v1737_v18, %v1733_v12  ;;  %vm1814_vm1 = vcmask 1046534  }
 0x1ff   : > { %v927_v39 = vpop.xlane.xlu0 %926  ;;  %v957_v16 = vpop.xlane.xlu1 %956 }
 0x200   : > { %v1594_v21 = vrot.slane %v927_v39, %v3325_v55  ;;  %v1668_v58 = vrot.slane %v957_v16, %v3331_v42 }
 0x202   : > { %v1595_v6 = vsel %vm1179_vm4, %v1594_v21, %v1590_v3  ;;  %v1669_v49 = vsel %vm1172_vm3, %v1668_v58, %v1664_v0 }
 0x203   : > { %v987_v60 = vpop.xlane.xlu0 %986  ;;  %v929_v1 = vpop.xlane.xlu1 %928 }
 0x204   : > { %v1742_v37 = vrot.slane %v987_v60, %v3309_v7  ;;  %v1599_v44 = vrot.slane %v929_v1, %v3351_v33 }
 0x206   : > { %v1743_v43 = vsel %vm1165_vm2, %v1742_v37, %v1738_v36  ;;  %v1600_v14 = vsel %vm1186_vm5, %v1599_v44, %v1595_v6  ;;  %vm1816_vm2 = vcmask 1047559  }
 0x207   : > { %v959_v34 = vpop.xlane.xlu0 %958  ;;  %v989_v63 = vpop.xlane.xlu1 %988 }
 0x208   : > { %v1673_v29 = vrot.slane %v959_v34, %v3325_v55  ;;  %v1747_v56 = vrot.slane %v989_v63, %v3331_v42 }
 0x20a   : > { %v1674_v24 = vsel %vm1179_vm4, %v1673_v29, %v1669_v49  ;;  %v1748_v25 = vsel %vm1172_vm3, %v1747_v56, %v1743_v43 }
 0x20b   : > { %v931_v48 = vpop.xlane.xlu0 %930  ;;  %v961_v32 = vpop.xlane.xlu1 %960 }
 0x20c   : > { %v1604_v7 = vrot.slane %v931_v48, %v3343_v30  ;;  %v1678_v15 = vrot.slane %v961_v32, %v3351_v33 }
 0x20e   : > { %v1605_v5 = vsel %vm1193_vm6, %v1604_v7, %v1600_v14  ;;  %v1679_v38 = vsel %vm1186_vm5, %v1678_v15, %v1674_v24 }
 0x20f   : > { %v991_v17 = vpop.xlane.xlu0 %990  ;;  %v933_v28 = vpop.xlane.xlu1 %932 }
 0x210   : > { %v1752_v61 = vrot.slane %v991_v17, %v3325_v55  ;;  %v1609_v42 = vrot.slane %v933_v28, %v3361_v9 }
 0x212   : > { %v1753_v13 = vsel %vm1179_vm4, %v1752_v61, %v1748_v25  ;;  %v1610_v40 = vsel %vm1200_vm7, %v1609_v42, %v1605_v5 }
 0x213   : > { %v963_v4 = vpop.xlane.xlu0 %962  ;;  %v993_v46 = vpop.xlane.xlu1 %992 }
 0x214   : > { %v1683_v45 = vrot.slane %v963_v4, %v3343_v30  ;;  %v1757_v35 = vrot.slane %v993_v46, %v3351_v33 }
 0x216   : > { %v1684_v41 = vsel %vm1193_vm6, %v1683_v45, %v1679_v38  ;;  %v1758_v53 = vsel %vm1186_vm5, %v1757_v35, %v1753_v13 }
 0x217   : > { %v935_v51 = vpop.xlane.xlu0 %934  ;;  %v965_v59 = vpop.xlane.xlu1 %964 }
 0x218   : > { %v1614_v55 = vrot.slane %v935_v51, %v3358_v31  ;;  %v1688_v50 = vrot.slane %v965_v59, %v3361_v9 }
 0x21a   : > { %v1615_v62 = vsel %vm1207_vm8, %v1614_v55, %v1610_v40  ;;  %v1689_v2 = vsel %vm1200_vm7, %v1688_v50, %v1684_v41 }
 0x21b   : > { %v995_v8 = vpop.xlane.xlu0 %994  ;;  %v937_v19 = vpop.xlane.xlu1 %936 }
 0x21c   : > { %v1762_v52 = vrot.slane %v995_v8, %v3343_v30  ;;  %v1619_v33 = vrot.slane %v937_v19, %v3377_v10 }
 0x21e   : > { %v1763_v12 = vsel %vm1193_vm6, %v1762_v52, %v1758_v53  ;;  %v1620_v3 = vsel %vm1214_vm9, %v1619_v33, %v1615_v62 }
 0x21f   : > { %v967_v27 = vpop.xlane.xlu0 %966  ;;  %v997_v54 = vpop.xlane.xlu1 %996 }
 0x220   : > { %v1693_v47 = vrot.slane %v967_v27, %v3358_v31  ;;  %v1767_v18 = vrot.slane %v997_v54, %v3361_v9  ;;  %v755_v27 = vld [vmem:[#allocation2] sm:$0xff] }
 0x222   : > { %v1694_v0 = vsel %vm1207_vm8, %v1693_v47, %v1689_v2  ;;  %v1768_v36 = vsel %vm1200_vm7, %v1767_v18, %v1763_v12  ;;  %v2015_v18 = vld [vmem:[%s3928_s25] ss:$0 sm:$0xff] (!%p2014_p1) }
 0x223   : > { %v939_v39 = vpop.xlane.xlu0 %938  ;;  %v969_v16 = vpop.xlane.xlu1 %968 }
 0x224   : > { %v1624_v30 = vrot.slane %v939_v39, %v3374_v11  ;;  %v1698_v21 = vrot.slane %v969_v16, %v3377_v10 }
 0x226   : > { %v1625_v58 = vsel %vm1221_vm10, %v1624_v30, %v1620_v3  ;;  %v1699_v6 = vsel %vm1214_vm9, %v1698_v21, %v1694_v0 }
 0x227   : > { %v999_v49 = vpop.xlane.xlu0 %998  ;;  %v941_v60 = vpop.xlane.xlu1 %940 }
 0x228   : > { %v1772_v1 = vrot.slane %v999_v49, %v3358_v31  ;;  %v1629_v9 = vrot.slane %v941_v60, %v3387_v22 }
 0x22a   : > { %v1773_v37 = vsel %vm1207_vm8, %v1772_v1, %v1768_v36  ;;  %v1630_v44 = vsel %vm1228_vm11, %v1629_v9, %v1625_v58 }
 0x22b   : > { %v971_v43 = vpop.xlane.xlu0 %970  ;;  %v1001_v14 = vpop.xlane.xlu1 %1000 }
 0x22c   : > { %v1703_v34 = vrot.slane %v971_v43, %v3374_v11  ;;  %v1777_v63 = vrot.slane %v1001_v14, %v3377_v10 }
 0x22e   : > { %v1704_v29 = vsel %vm1221_vm10, %v1703_v34, %v1699_v6  ;;  %v1778_v56 = vsel %vm1214_vm9, %v1777_v63, %v1773_v37 }
 0x22f   : > { %v943_v24 = vpop.xlane.xlu0 %942  ;;  %v973_v25 = vpop.xlane.xlu1 %972 }
 0x230   : > { %v1634_v31 = vrot.slane %v943_v24, %v3384_v23  ;;  %v1708_v48 = vrot.slane %v973_v25, %v3387_v22 }
 0x232   : > { %v1635_v32 = vsel %vm1235_vm12, %v1634_v31, %v1630_v44  ;;  %v1709_v7 = vsel %vm1228_vm11, %v1708_v48, %v1704_v29 }
 0x233   : > { %v1003_v15 = vpop.xlane.xlu0 %1002  ;;  %v945_v5 = vpop.xlane.xlu1 %944 }
 0x234   : > { %v1782_v38 = vrot.slane %v1003_v15, %v3374_v11  ;;  %v1639_v10 = vrot.slane %v945_v5, %v3403_v26 }
 0x236   : > { %v1783_v17 = vsel %vm1221_vm10, %v1782_v38, %v1778_v56  ;;  %v1640_v28 = vsel %vm1242_vm13, %v1639_v10, %v1635_v32 }
 0x237   : > { %v975_v61 = vpop.xlane.xlu0 %974  ;;  %v1005_v42 = vpop.xlane.xlu1 %1004 }
 0x238   : > { %v1713_v13 = vrot.slane %v975_v61, %v3384_v23  ;;  %v1787_v40 = vrot.slane %v1005_v42, %v3387_v22 }
 0x23a   : > { %v1714_v4 = vsel %vm1235_vm12, %v1713_v13, %v1709_v7  ;;  %v1788_v46 = vsel %vm1228_vm11, %v1787_v40, %v1783_v17 }
 0x23b   : > { %v947_v45 = vpop.xlane.xlu0 %946  ;;  %v977_v35 = vpop.xlane.xlu1 %976 }
 0x23c   : > { %v1644_v11 = vrot.slane %v947_v45, %v3400_v57  ;;  %v1718_v41 = vrot.slane %v977_v35, %v3403_v26 }
 0x23e   : > { %v1645_v53 = vsel %vm1249_vm14, %v1644_v11, %v1640_v28  ;;  %v1719_v51 = vsel %vm1242_vm13, %v1718_v41, %v1714_v4 }
 0x23f   : > { %v1813_v59 = vsel %vm1812_vm0, %v1645_v53, %v3656_v20  ;;  %v1007_v55 = vpop.xlane.xlu0 %1006  ;;  %v979_v50 = vpop.xlane.xlu1 %978 }
 0x240   : > { %v1792_v22 = vrot.slane %v1007_v55, %v3384_v23  ;;  %v1723_v62 = vrot.slane %v979_v50, %v3400_v57 }
 0x242   : > { %v1793_v2 = vsel %vm1235_vm12, %v1792_v22, %v1788_v46  ;;  %v1724_v8 = vsel %vm1249_vm14, %v1723_v62, %v1719_v51 }
 0x243   : > { %v1815_v19 = vsel %vm1814_vm1, %v1724_v8, %v1813_v59  ;;  %v1009_v52 = vpop.xlane.xlu0 %1008  ;;  %v1011_v33 = vpop.xlane.xlu1 %1010 }
 0x244   : > { %v1797_v12 = vrot.slane %v1009_v52, %v3403_v26  ;;  %v1802_v3 = vrot.slane %v1011_v33, %v3400_v57 }
 0x245   : > { %1824 = sbr.rel (%p2014_p1) target bundleno = 598 (0x256), region = 56 }
 0x246   : > { %v1798_v20 = vsel %vm1242_vm13, %v1797_v12, %v1793_v2 }
 0x247   : > { %v1803_v23 = vsel %vm1249_vm14, %v1802_v3, %v1798_v20 }
 0x248   : > { %v1817_v54 = vsel %vm1816_vm2, %v1803_v23, %v1815_v19 }
 0x249   : > { %v1819_v47 = vmax.f32 %v755_v27, %v1817_v54 }
 0x24b   : > { %1820 = vst [vmem:[#allocation2] sm:$0xff] %v1819_v47 }
 0x252   : > { %v1826_v26 = vld [vmem:[#allocation2] sm:$0xff] }
 0x253   : > { %v1833_v0 = vmul.f32 %v2015_v18, %v1826_v26 }
 0x255   : > { %1834 = vst [vmem:[%s333_s6] sm:$0xff] %v1833_v0 }
 0x256 PF: > { %s3929_s13 = sld [smem:[#allocation16_spill]]  ;;  %s3930_s7 = sld [smem:[#allocation38_spill]] }
 0x257   : > { %s1850_s3 = sshll.u32 %s333_s6, 4  ;;  %s1836_s17 = scalar_lea.sflag [#allocation5], %s331_s20  ;;  %s1851_s3 = int_to_ptr.vmem [resolvable:$true] %s1850_s3 }
 0x258   : > { %s2330_s21 = scalar_lea.vmem %s1851_s3, 128  ;;  %p3931_p3 = scmp.ne.s32.totalorder %s3889_s4, 0 }
 0x259   : > { %p2331_p13 = scmp.ne.s32.totalorder %s1851_s3, %s2330_s21  ;;  %s2490_s24 = smov [#allocation9]  }
 0x25a   : > { %s2334_s18 = sshll.u32 %s2490_s24, 4  ;;  %s2335_s18 = int_to_ptr.vmem [resolvable:$false] %s2334_s18 }
 0x25b   : > { %p2332_p8 = pnand %p2331_p13, %p3931_p3  ;;  %s2336_s9 = scalar_lea.vmem %s2335_s18, 256 }
 0x25c   : > { %s2017_s11 = sshll.u32 %s3929_s13, 7  ;;  %p2337_p11 = scmp.lt.s32.totalorder %s1851_s3, %s2335_s18 }
 0x25d   : > { %s3760_s30 = scalar_lea.hbm %s3930_s7, %s2017_s11  ;;  %p2333_p7 = pneg %p2332_p8 }
 0x25e   : > { %p2338_p12 = scmp.lt.s32.totalorder %s2336_s9, %s2330_s21 }
 0x260   : > { %p2339_p2 = por %p2338_p12, %p2337_p11 }
 0x262   : > { %p2340_p9 = pnand %p2339_p2, %p2333_p7 }
 0x264   : > { %2343 = shalt.err (!%p2340_p9)
}
 0x265   : > { %s2344_s20 = scalar_lea.hbm %s3760_s30, 128  ;;  %s2348_s6 = scalar_lea.hbm %s3930_s7, 256 }
 0x266   : > { %p2345_p0 = scmp.ne.s32.totalorder %s3760_s30, %s2344_s20  ;;  %p2349_p6 = scmp.lt.u32.totalorder %s3760_s30, %s3930_s7 }
 0x267   : > { %p2350_p4 = scmp.lt.u32.totalorder %s2348_s6, %s2344_s20  ;;  %p2352_p13 = scmp.lt.u32.totalorder %s2344_s20, %s3760_s30 }
 0x268   : > { %p2346_p5 = pnand %p2345_p0, %p3931_p3 }
 0x269   : > { %p2351_p1 = por %p2350_p4, %p2349_p6 }
 0x26a   : > { %p2347_p10 = pneg %p2346_p5 }
 0x26b   : > { %p2353_p8 = por %p2352_p13, %p2351_p1 }
 0x26d   : > { %p2354_p7 = pnand %p2353_p8, %p2347_p10 }
 0x26f   : > { %2357 = shalt.err (!%p2354_p7)
}
 0x270   : > { %2104 = dma.vmem_to_hbm [thread:$0]  (%p3931_p3), %s1851_s3, 128, %s3760_s30, %s1836_s17  }
 0x271 PF: > { %s3932_s12 = sld [smem:[#allocation22_spill]]  ;;  %p2121_p11 = scmp.ge.s32.totalorder %s2480_s28, 2 }
 0x272   : > { %s1862_s1 = sand.u32 1, %s2428_s15  }
 0x273   : > { %s1863_s25 = scalar_lea.sflag [#allocation5], %s1862_s1 }
 0x277   : > { %p3933_p12 = scmp.ne.s32.totalorder %s3932_s12, 0 }
 0x279   : > { %p2117_p2 = pnand %p2121_p11, %p3933_p12 }
 0x27b   : > { %2423 = dma.done.wait (!%p2117_p2), %s1863_s25, 128  }
 0x27c   : > { %2425 = vsyncadd (!%p2117_p2), %s1863_s25, 4294967168  ;;  %s23_s28 = sadd.s32 1, %s2480_s28   ;;  %s3935_s4 = sld [smem:[#allocation13_spill]] }
 0x27d   : > { %p3788_p9 = scmp.ge.s32.totalorder %s23_s28, 6   ;;  %s3936_s17 = sld [smem:[#allocation21_spill]] }
 0x27e   : > { %s3937_s11 = sld [smem:[#allocation14_spill]]  ;;  %s3938_s20 = sld [smem:[#allocation19_spill]] }
 0x27f   : > { %s3939_s2 = sld [smem:[#allocation20_spill]]  ;;  %s3940_s14 = sld [smem:[#allocation17_spill]] }
 0x280   : > { %s3941_s30 = sld [smem:[#allocation18_spill]]  ;;  %s3942_s15 = smov %s2432_s16 }
 0x281   : > { %s3944_s18 = smov %s2444_s19  ;;  %s3946_s21 = smov %s2456_s22 }
 0x282   : > { %s3943_s16 = smov %s3935_s4  ;;  %s3947_s22 = smov %s2460_s23 }
 0x283   : > { %s3949_s24 = smov %s2472_s26  ;;  %s3950_s25 = smov %s2476_s27 }
 0x284   : > { %s3945_s19 = smov %s3937_s11  ;;  %22 = sbr.rel (!%p3788_p9) target bundleno = 17 (0x11), region = 116 }
 0x285   : > { %s3948_s23 = smov %s3939_s2  ;;  %s3951_s26 = smov %s3940_s14 }
 0x286   : > { %s3952_s27 = smov %s3941_s30 }
 0x28b   :  { %1868 = vsyncpa [#allocation4], 1 }
 0x28c   :  { %1870 = vsyncpa [#allocation4 + $0x1], 1 }
 0x28d   :  { %1871 = vsyncpa [#allocation7], 1 }
 0x28e   :  { %1873 = vsyncpa [#allocation7 + $0x1], 1 }
 0x28f   :  { %1874 = vsyncpa [#allocation5], 1 }
 0x290   :  { %1876 = vsyncpa [#allocation5 + $0x1], 1 }

</bundles_post_ra>
